<compile_context>
chip_gen: v6e
topology: v6e:2x2x1
jax: 0.10.0
libtpu: 0.0.40
codegen_flags: <defaults>
</compile_context>

<pallas_src>
import jax
import jax.numpy as jnp
from jax.experimental import pallas as pl
from jax.experimental.pallas import tpu as pltpu

# ---------------------------------------------------------------------------
# Model dimensions (scaled-down vocab; hidden size kept at 768 as the module implies).
# VOCAB is intentionally NOT a multiple of TILE_V to exercise the padded-vocab path
# (the real bert-base-chinese vocab is 21128, also not tile-aligned).
# ---------------------------------------------------------------------------
HIDDEN = 768          # bert-base hidden size (nn.Linear in_features)
VOCAB = 2000          # stand-in for bert_tokenizer.vocab_size (21128), kept small
TOKEN_POS = 16        # forward uses last_hidden_state[:, 16]
TILE_V = 1024         # vocab tile (multiple of 128; bf16 tile = 1.5 MB, well under VMEM)


def fm_head_kernel(x_ref, w_ref, b_ref, o_ref):
    """One vocab tile of the linear head: o = x @ W_tile + b_tile.

    x_ref: [B, H]       bf16   (token-16 hidden state, resident across vocab tiles)
    w_ref: [H, TILE_V]  bf16
    b_ref: [1, TILE_V]  f32
    o_ref: [B, TILE_V]  f32
    """
    acc = jnp.dot(x_ref[...], w_ref[...], preferred_element_type=jnp.float32)
    o_ref[...] = acc + b_ref[...]


def fm_model_head(last_hidden_state, weight, bias):
    """result = last_hidden_state[:, TOKEN_POS] @ weight + bias  via Pallas.

    last_hidden_state: [B, S, H] float32
    weight:            [H, V]    float32  (transpose of PyTorch nn.Linear.weight)
    bias:              [V]       float32
    returns:           [B, V]    float32
    """
    B, S, H = last_hidden_state.shape
    V = weight.shape[1]
    assert H == HIDDEN and S > TOKEN_POS

    # Token selection + dtype cast are layout plumbing -> do them in the wrapper.
    x = last_hidden_state[:, TOKEN_POS].astype(jnp.bfloat16)          # [B, H]
    w = weight.astype(jnp.bfloat16)                                   # [H, V] bf16 stream

    # Pad the vocab axis to a multiple of TILE_V (handles vocab sizes like 21128).
    n_tiles = pl.cdiv(V, TILE_V)
    Vp = n_tiles * TILE_V
    if Vp != V:
        w = jnp.pad(w, ((0, 0), (0, Vp - V)))
        bias = jnp.pad(bias, (0, Vp - V))
    bias2d = bias.reshape(1, Vp).astype(jnp.float32)

    out = pl.pallas_call(
        fm_head_kernel,
        out_shape=jax.ShapeDtypeStruct((B, Vp), jnp.float32),
        grid_spec=pl.GridSpec(
            grid=(n_tiles,),
            in_specs=[
                # Activation row: constant block index -> stays resident in VMEM.
                pl.BlockSpec((B, H), lambda j: (0, 0)),
                # Vocab-tiled weight columns (the bandwidth-dominant stream).
                pl.BlockSpec((H, TILE_V), lambda j: (0, j)),
                # Matching bias tile.
                pl.BlockSpec((1, TILE_V), lambda j: (0, j)),
            ],
            out_specs=pl.BlockSpec((B, TILE_V), lambda j: (0, j)),
        ),
        compiler_params=pltpu.CompilerParams(
            # Vocab tiles are independent -> shard across TensorCores on v7x.
            dimension_semantics=("parallel",),
            # Plenty of headroom for the real vocab if TILE_V is pushed higher.
            vmem_limit_bytes=64 * 1024 * 1024,
        ),
    )(x, w, bias2d)

    return out[:, :V]


# ---------------------------------------------------------------------------
# Deterministic stand-in for the frozen BERT encoder (plain JAX glue).
# ---------------------------------------------------------------------------
def bert_standin(input_ids, attention_mask, token_type_ids, emb_tok, emb_seg):
    """Produces a deterministic [B, S, H] 'last_hidden_state'."""
    h = emb_tok[input_ids] + emb_seg[token_type_ids]          # [B, S, H]
    h = h * attention_mask[..., None].astype(h.dtype)
    return jnp.tanh(h)


if __name__ == "__main__":
    key = jax.random.PRNGKey(0)
    k_tok, k_seg, k_w, k_b, k_ids, k_seg_ids = jax.random.split(key, 6)

    B, S = 2, 32

    # Deterministic "BERT" stand-in tables and head parameters.
    emb_tok = jax.random.normal(k_tok, (VOCAB, HIDDEN), dtype=jnp.float32) * 0.02
    emb_seg = jax.random.normal(k_seg, (2, HIDDEN), dtype=jnp.float32) * 0.02

    # nn.Linear(768, vocab_size): weight [V, H], bias [V].  Stored transposed as [H, V].
    weight = jax.random.normal(k_w, (HIDDEN, VOCAB), dtype=jnp.float32) * 0.02
    bias = jax.random.normal(k_b, (VOCAB,), dtype=jnp.float32) * 0.02

    # Example inputs consistent with the forward signature.
    input_ids = jax.random.randint(k_ids, (B, S), 0, VOCAB, dtype=jnp.int32)
    attention_mask = jnp.ones((B, S), dtype=jnp.int32)
    token_type_ids = jax.random.randint(k_seg_ids, (B, S), 0, 2, dtype=jnp.int32)

    # Frozen-BERT stand-in (glue, plain JAX).
    last_hidden_state = bert_standin(input_ids, attention_mask, token_type_ids,
                                     emb_tok, emb_seg)          # [B, S, H]

    # Pallas kernel: token-16 selection + bf16-streamed linear head.
    result = fm_model_head(last_hidden_state, weight, bias)      # [B, V]
    result = jax.block_until_ready(result)

    # Correctness check: reference uses the same bf16 inputs / f32 accumulation.
    x_bf = last_hidden_state[:, TOKEN_POS].astype(jnp.bfloat16)
    w_bf = weight.astype(jnp.bfloat16)
    ref = jnp.dot(x_bf, w_bf, preferred_element_type=jnp.float32) + bias
    assert result.shape == (B, VOCAB)
    assert jnp.allclose(result, ref, atol=1e-2, rtol=1e-2)

    print("KERNEL_OK")
</pallas_src>

<mosaic_0001>
module attributes {stable_mosaic.version = 11 : i64} {
  func.func @fm_head_kernel(%arg0: i32, %arg1: memref<2x768xbf16, #tpu.memory_space<vmem>>, %arg2: memref<768x1024xbf16, #tpu.memory_space<vmem>>, %arg3: memref<1x1024xf32, #tpu.memory_space<vmem>>, %arg4: memref<2x1024xf32, #tpu.memory_space<vmem>>) attributes {dimension_semantics = [#tpu.dimension_semantics<parallel>], iteration_bounds = array<i64: 2>, scalar_prefetch = 0 : i64, scratch_operands = 0 : i64, tpu.core_type = #tpu.core_type<tc>, window_params = [{pipeline_mode = #tpu.pipeline_mode<synchronous>, transform_indices = @transform_0, window_bounds = array<i64: 2, 768>}, {transform_indices = @transform_1, window_bounds = array<i64: 768, 1024>}, {transform_indices = @transform_2, window_bounds = array<i64: 1, 1024>}, {transform_indices = @transform_3, window_bounds = array<i64: 2, 1024>}]} {
    %c0 = arith.constant 0 : index
    %c0_0 = arith.constant 0 : index
    %0 = vector.load %arg1[%c0, %c0_0] : memref<2x768xbf16, #tpu.memory_space<vmem>>, vector<2x768xbf16>
    %c0_1 = arith.constant 0 : index
    %c0_2 = arith.constant 0 : index
    %1 = vector.load %arg2[%c0_1, %c0_2] : memref<768x1024xbf16, #tpu.memory_space<vmem>>, vector<768x1024xbf16>
    %cst = arith.constant dense<0.000000e+00> : vector<2x1024xf32>
    %2 = tpu.matmul %0, %1, %cst {dimension_numbers = #tpu.dot_dimension_numbers<[1], [0], [0], [1], [0, 0, 1, 1], [], []>} : vector<2x768xbf16>, vector<768x1024xbf16>, vector<2x1024xf32> -> vector<2x1024xf32>
    %c0_3 = arith.constant 0 : index
    %c0_4 = arith.constant 0 : index
    %3 = vector.load %arg3[%c0_3, %c0_4] : memref<1x1024xf32, #tpu.memory_space<vmem>>, vector<1x1024xf32>
    %4 = vector.broadcast %3 : vector<1x1024xf32> to vector<2x1024xf32>
    %5 = arith.addf %2, %4 : vector<2x1024xf32>
    %c0_5 = arith.constant 0 : index
    %c0_6 = arith.constant 0 : index
    %6 = vector.load %arg4[%c0_5, %c0_6] : memref<2x1024xf32, #tpu.memory_space<vmem>>, vector<2x1024xf32>
    tpu.vector_store %arg4[%c0_5, %c0_6], %5 {strides = array<i32>} : memref<2x1024xf32, #tpu.memory_space<vmem>>, vector<2x1024xf32>,
    return
  }
  func.func @transform_0(%arg0: i32) -> (i32, i32) {
    %c0_i32 = arith.constant 0 : i32
    %c0_i32_0 = arith.constant 0 : i32
    %c0_i32_1 = arith.constant 0 : i32
    return %c0_i32, %c0_i32_0 : i32, i32
  }
  func.func @transform_1(%arg0: i32) -> (i32, i32) {
    %c0_i32 = arith.constant 0 : i32
    %c0_i32_0 = arith.constant 0 : i32
    return %c0_i32, %arg0 : i32, i32
  }
  func.func @transform_2(%arg0: i32) -> (i32, i32) {
    %c0_i32 = arith.constant 0 : i32
    %c0_i32_0 = arith.constant 0 : i32
    return %c0_i32, %arg0 : i32, i32
  }
  func.func @transform_3(%arg0: i32) -> (i32, i32) {
    %c0_i32 = arith.constant 0 : i32
    %c0_i32_0 = arith.constant 0 : i32
    return %c0_i32, %arg0 : i32, i32
  }
}

</mosaic_0001>

<bundles_post_ra>
// kernel: tpu_custom_call.1
= control target key start
LH: loop header
LB: loop body
LE: loop exit
PB: predicated region body
PF: predicated region fallthrough
CT: control target
= control target key end

     0   :  { %8 = vsyncpa [#allocation3], 0  ;;  %s4647_s0 = inlined_call_operand.hbm [shape: bf16[2,768], index: 0, kind: input, shape index: {}]   ;;  %s4648_s1 = inlined_call_operand.hbm [shape: bf16[768,2048], index: 1, kind: input, shape index: {}]   ;;  %s4649_s2 = inlined_call_operand.hbm [shape: f32[1,2048], index: 2, kind: input, shape index: {}]   ;;  %s4650_s3 = inlined_call_operand.hbm [shape: f32[2,2048], index: 3, kind: output, shape index: {}]  }
   0x1   :  { %9 = vsyncpa [#allocation6], 0 }
   0x2   :  { %11 = vsyncpa [#allocation6 + $0x1], 0 }
   0x3   :  { %12 = vsyncpa [#allocation4], 0 }
   0x4   :  { %14 = vsyncpa [#allocation4 + $0x1], 0  ;;  %s3952_s12 = smov 0   ;;  %s3954_s13 = smov 0  }
   0x5   :  { %s3956_s14 = smov 0   ;;  %s3958_s15 = smov 0  }
   0x6 LB: > { %s3973_s16 = sadd.s32 1, %s3921_s15   ;;  %s48_s17 = sadd.s32 1, %s3917_s14  ;;  %s3921_s15 = sphi %s3958_s15, %s4670_s15   ;;  %s3917_s14 = sphi %s3956_s14, %s4669_s14   ;;  %s3913_s13 = sphi %s3954_s13, %s4668_s13   ;;  %s3909_s12 = sphi %s3952_s12, %s4667_s12  }
   0x7   : > { %s45_s18 = ssub.s32 %s3921_s15, %s3973_s16  ;;  %p55_p0 = scmp.ne.s32.totalorder %s3917_s14, %s3913_s13 }
   0x8   : > { %p46_p1 = scmp.eq.s32.totalorder %s45_s18, 0  ;;  %p56_p2 = scmp.eq.s32.totalorder %s3921_s15, 0 }
   0x9   : > { %p3729_p4 = scmp.lt.s32.totalorder %s3921_s15, 2  ;;  %s148_s20 = sand.u32 1, %s3921_s15  }
   0xa   : > { %s3984_s19 = scalar_select %p46_p1, %s3917_s14, %s48_s17  }
   0xb   : > { %p57_p5 = por %p56_p2, %p55_p0  ;;  %s150_s21 = sand.u32 1, %s3917_s14  }
   0xc   : > { %s3701_s22 = smul.u32 3072, %s150_s21  ;;  %s3698_s23 = sshll.u32 %s3921_s15, 9 }
   0xd   : > { %s3997_s26 = scalar_lea.hbm %s4648_s1, %s3698_s23  ;;  %p3999_p6 = pnand %p3729_p4, %p57_p5 }
   0xe   : > { %s152_s28 = scalar_lea.vmem [#allocation5], %s3701_s22  ;;  %s4005_s30 = scalar_lea.sflag [#allocation6], %s148_s20 }
   0xf   : > { %s159_s29 = sshll.u32 %s152_s28, 4  ;;  %s3771_s4 = scalar_lea.hbm %s3997_s26, 49152  ;;  %s4003_s29 = int_to_ptr.vmem [resolvable:$true] %s159_s29 }
  0x10   : > { %p3772_p7 = scmp.ne.s32.totalorder %s3997_s26, %s3771_s4  ;;  %p4651_p8 = pneg %p3999_p6 }
  0x11   : > { %s3776_s7 = scalar_lea.hbm %s4648_s1, 98304  ;;  %p3777_p11 = scmp.lt.s32.totalorder %s3997_s26, %s4648_s1 }
  0x12   : > { %p3774_p9 = pnand %p4651_p8, %p3772_p7  ;;  %p3778_p12 = scmp.lt.s32.totalorder %s3776_s7, %s3771_s4 }
  0x14   : > { %p3775_p10 = pneg %p3774_p9  ;;  %p3779_p13 = por %p3778_p12, %p3777_p11 }
  0x16   : > { %p3780_p1 = pnand %p3779_p13, %p3775_p10 }
  0x18   : > { %3783 = shalt.err (!%p3780_p1)
}
  0x19   : > { %s3784_s10 = scalar_lea.vmem %s4003_s29, 49152  ;;  %s3923_s11 = smov [#allocation5]  }
  0x1a   : > { %p3785_p2 = scmp.ne.s32.totalorder %s4003_s29, %s3784_s10  ;;  %s3789_s17 = sshll.u32 %s3923_s11, 4  ;;  %s3790_s17 = int_to_ptr.vmem [resolvable:$false] %s3789_s17 }
  0x1b   : > { %s3791_s18 = scalar_lea.vmem %s3790_s17, 98304  ;;  %p3792_p7 = scmp.lt.s32.totalorder %s4003_s29, %s3790_s17 }
  0x1c   : > { %p3787_p4 = pnand %p3785_p2, %p4651_p8  ;;  %p3793_p9 = scmp.lt.s32.totalorder %s3791_s18, %s3784_s10 }
  0x1e   : > { %p3788_p5 = pneg %p3787_p4  ;;  %p3794_p3 = por %p3793_p9, %p3792_p7 }
  0x20   : > { %p3795_p11 = pnand %p3794_p3, %p3788_p5 }
  0x22   : > { %3798 = shalt.err (!%p3795_p11)
}
  0x23   : > { %s3924_s20 = smov 1024   ;;  %s3925_s22 = smov 512  }
  0x24   : > { %s3926_s23 = smov 32   ;;  %s4033_s24 = sadd.s32 4294967295, %s3921_s15  }
  0x25   : > { %3720 = dma.hbm_to_vmem [thread:$0]  (!%p3999_p6), %s3997_s26, 49152, %s4003_s29, %s4005_s30, %s3924_s20, %s3925_s22, %s3926_s23  }
  0x26   : > { %s3296_s25 = sadd.s32 4294967294, %s3921_s15   ;;  %p61_p3 = scmp.ne.s32.totalorder %s3913_s13, %s3909_s12 }
  0x27   : > { %p4653_p10 = scmp.eq.s32.totalorder %s4033_s24, 0  ;;  %p111_p12 = scmp.eq.s32.totalorder %s4033_s24, 1 }
  0x28   : > { %p117_p13 = scmp.eq.s32.totalorder %s3296_s25, 1  ;;  %p3297_p1 = scmp.ge.s32.totalorder %s3921_s15, 1 }
  0x29   : > { %p4043_p2 = por %p4653_p10, %p61_p3  ;;  %p4050_p4 = por %p111_p12, %p55_p0 }
  0x2a   : > { %p4054_p5 = por %p117_p13, %p61_p3  ;;  %p124_p7 = scmp.lt.s32.totalorder %s3921_s15, 3 }
  0x2b   : > { %s4656_s28 = scalar_select %p4043_p2, 1, 0 }
  0x2c   : > { %s4657_s26 = scalar_select %p4050_p4, 1, 0 }
  0x2d   : > { %s4658_s29 = scalar_select %p4054_p5, 1, 0 }
  0x2e   : > { %p4059_p9 = pnand %p3297_p1, %p124_p7  ;;  %s3927_s5 = smov [#allocation2]  }
  0x2f   : > { %s137_s6 = sshll.u32 %s3927_s5, 4  ;;  %s3302_s7 = sshll.u32 %s150_s21, 3  ;;  %s138_s6 = int_to_ptr.vmem [resolvable:$true] %s137_s6 }
  0x30   : > { %p3713_p11 = pneg %p4059_p9  ;;  %s3699_s8 = sshll.u32 %s3921_s15, 7 }
  0x31   : > { %s173_s9 = scalar_lea.vmem [#allocation7], %s3302_s7  ;;  %s4073_s18 = scalar_lea.hbm %s4649_s2, %s3699_s8 }
  0x32   : > { %s181_s10 = sshll.u32 %s173_s9, 4  ;;  %p3714_p0 = pnand %p3713_p11, %p4653_p10  ;;  %s4075_s10 = int_to_ptr.vmem [resolvable:$true] %s181_s10 }
  0x33   : > { %s3810_s20 = scalar_lea.vmem %s138_s6, 96  ;;  %p3818_p7 = scmp.lt.s32.totalorder %s138_s6, %s138_s6 }
  0x34   : > { %p3801_p3 = pneg %p3714_p0  ;;  %p3811_p12 = scmp.ne.s32.totalorder %s138_s6, %s3810_s20 }
  0x35   : > { %p3819_p8 = scmp.lt.s32.totalorder %s3810_s20, %s3810_s20 }
  0x36   : > { %p3813_p13 = pnand %p3811_p12, %p3801_p3 }
  0x37   : > { %p3820_p5 = por %p3819_p8, %p3818_p7 }
  0x38   : > { %p3814_p1 = pneg %p3813_p13 }
  0x3a   : > { %p3821_p4 = pnand %p3820_p5, %p3814_p1 }
  0x3c   : > { %3824 = shalt.err (!%p3821_p4)
}
  0x3d   : > { %3716 = dma.hbm_to_vmem [thread:$0]  (!%p3714_p0), %s4647_s0, 96, %s138_s6, [#allocation3]  }
  0x3e   : > { %s3825_s23 = scalar_lea.hbm %s4073_s18, 128  ;;  %p4660_p10 = pneg %p3999_p6 }
  0x3f   : > { %p3826_p11 = scmp.ne.s32.totalorder %s4073_s18, %s3825_s23  ;;  %s3830_s7 = scalar_lea.hbm %s4649_s2, 256 }
  0x40   : > { %p3831_p8 = scmp.lt.s32.totalorder %s4073_s18, %s4649_s2  ;;  %p3832_p4 = scmp.lt.s32.totalorder %s3830_s7, %s3825_s23 }
  0x41   : > { %p3828_p2 = pnand %p3826_p11, %p4660_p10 }
  0x42   : > { %p3833_p5 = por %p3832_p4, %p3831_p8 }
  0x43   : > { %p3829_p3 = pneg %p3828_p2 }
  0x45   : > { %p3834_p12 = pnand %p3833_p5, %p3829_p3 }
  0x47   : > { %3837 = shalt.err (!%p3834_p12)
}
  0x48   : > { %s3838_s6 = scalar_lea.vmem %s4075_s10, 128  ;;  %s3928_s11 = smov [#allocation7]  }
  0x49   : > { %p3839_p0 = scmp.ne.s32.totalorder %s4075_s10, %s3838_s6  ;;  %s3843_s17 = sshll.u32 %s3928_s11, 4  ;;  %s3844_s17 = int_to_ptr.vmem [resolvable:$false] %s3843_s17 }
  0x4a   : > { %s3845_s20 = scalar_lea.vmem %s3844_s17, 256  ;;  %p3846_p1 = scmp.lt.s32.totalorder %s4075_s10, %s3844_s17 }
  0x4b   : > { %p3841_p2 = pnand %p3839_p0, %p4660_p10  ;;  %p3847_p7 = scmp.lt.s32.totalorder %s3845_s20, %s3838_s6 }
  0x4d   : > { %p3842_p13 = pneg %p3841_p2  ;;  %p3848_p11 = por %p3847_p7, %p3846_p1 }
  0x4f   : > { %p3849_p8 = pnand %p3848_p11, %p3842_p13 }
  0x51   : > { %3852 = shalt.err (!%p3849_p8)
}
  0x52   : > { %3723 = dma.hbm_to_vmem [thread:$0]  (!%p3999_p6), %s4073_s18, 128, %s4075_s10, %s4005_s30  }
  0x53   : > { %190 = sbr.rel (%p4059_p9) target bundleno = 701 (0x2bd), region = 32  ;;  %p4661_p3 = scmp.eq.s32.totalorder (!%p4059_p9), %s4033_s24, 0 }
  0x58   : > { %3896 = dma.done.wait (%p4661_p3), [#allocation3], 96   ;;  %p4662_p4 = pmov %p4661_p3 }
  0x59   : > { %s196_s21 = sand.u32 1, %s4033_s24   ;;  %s4111_s22 = sand.u32 1, %s3913_s13  }
  0x5a   : > { %3898 = vsyncadd (%p4662_p4), [#allocation3], 4294967200  ;;  %s3702_s27 = smul.u32 3072, %s4111_s22  ;;  %s197_s23 = scalar_lea.sflag [#allocation6], %s196_s21 }
  0x5b   : > { %p4663_p6 = scmp.ne.s32.totalorder %s4656_s28, 0 }
  0x5c   : > { %s4114_s25 = scalar_lea.vmem [#allocation5], %s3702_s27 }
  0x5d   : > { %3900 = dma.done.wait (%p4663_p6), %s197_s23, 49280  }
  0x5e   : > { %3902 = vsyncadd (%p4663_p6), %s197_s23, 4294918016  ;;  %v297_v0 = vld [vmem:[%s4114_s25 + $0x1c0] sm:$0xff]  ;;  %v627_v32 = vlaneseq  ;;  %v3929_v33 = vmov 1966171168   ;;  %v240_v59 = vld [vmem:[#allocation2] sm:$0x3f] }
  0x5f   : > { %v301_v1 = vld [vmem:[%s4114_s25 + $0x1e0] sm:$0xff]  ;;  %v670_v34 = vunpack.c.l.s4 %v3929_v33  ;;  %s3307_s30 = sshll.u32 %s4111_s22, 3  ;;  %s3308_s4 = sshll.u32 %s4111_s22, 4 }
  0x60   : > { %v425_v2 = vld [vmem:[%s4114_s25 + $0x5c0] sm:$0xff]  ;;  %v3366_v3 = vcombine.high %v297_v0, %v301_v1  ;;  %v3365_v5 = vcombine.low %v297_v0, %v301_v1  ;;  %v4142_v43 = vshrl.u32 %v627_v32, 7  ;;  %s209_s28 = scalar_lea.vmem [#allocation7], %s3307_s30  ;;  %s4599_s10 = scalar_lea.vmem [#allocation8], %s3308_s4 }
  0x61   : > { %v429_v4 = vld [vmem:[%s4114_s25 + $0x5e0] sm:$0xff]  ;;  %v671_v44 = vunpack.c.0.s8 %v670_v34  ;;  %s3700_s18 = sshll.u32 %s4033_s24, 8  ;;  %s3194_s5 = sshll.u32 %s4599_s10, 4  ;;  %s3195_s5 = int_to_ptr.vmem [resolvable:$true] %s3194_s5 }
  0x62   : > { %v289_v6 = vld [vmem:[%s4114_s25 + $0x180] sm:$0xff]  ;;  %v3494_v8 = vcombine.high %v425_v2, %v429_v4  ;;  %v3493_v9 = vcombine.low %v425_v2, %v429_v4  ;;  %2641 = vmatprep.subr.bf16.mxu0 %v3366_v3  ;;  %s3192_s9 = scalar_lea.hbm %s4650_s3, %s3700_s18  ;;  %s3180_s6 = scalar_lea.sflag [#allocation4], %s4111_s22 }
  0x63   : > { %v293_v7 = vld [vmem:[%s4114_s25 + $0x1a0] sm:$0xff]  ;;  %2642 = vmatpush1.bf16.msra.mxu0 %v3365_v5  ;;  %v4149_v53 = vsub.s32 %v671_v44, %v4142_v43  ;;  %s3853_s11 = scalar_lea.vmem %s3195_s5, 256  ;;  %p4664_p5 = scmp.ne.s32.totalorder %s4657_s26, 0 }
  0x64   : > { %v3358_v10 = vcombine.high %v289_v6, %v293_v7  ;;  %v417_v11 = vld [vmem:[%s4114_s25 + $0x580] sm:$0xff]  ;;  %2682 = vmatprep.subr.bf16.mxu1 %v3494_v8  ;;  %v3357_v18 = vcombine.low %v289_v6, %v293_v7  ;;  %p3854_p9 = scmp.ne.s32.totalorder %s3195_s5, %s3853_s11  ;;  %s3931_s17 = smov [#allocation8]  }
  0x65   : > { %v421_v12 = vld [vmem:[%s4114_s25 + $0x5a0] sm:$0xff]  ;;  %2683 = vmatpush1.bf16.msra.mxu1 %v3493_v9  ;;  %v4156_v63 = vrot.slane %v240_v59, %v4149_v53  ;;  %s3857_s20 = sshll.u32 %s3931_s17, 4  ;;  %s3858_s20 = int_to_ptr.vmem [resolvable:$false] %s3857_s20 }
  0x66   : > { %v281_v13 = vld [vmem:[%s4114_s25 + $0x140] sm:$0xff]  ;;  %v3486_v14 = vcombine.high %v417_v11, %v421_v12  ;;  %2643 = vmatprep.subr.bf16.mxu0 %v3358_v10  ;;  %v3485_v19 = vcombine.low %v417_v11, %v421_v12  ;;  %p3855_p12 = pnand %p3854_p9, %p4664_p5  ;;  %s3859_s24 = scalar_lea.vmem %s3858_s20, 512 }
  0x67   : > { %v285_v15 = vld [vmem:[%s4114_s25 + $0x160] sm:$0xff]  ;;  %2644 = vmatpush1.bf16.msra.mxu0 %v3357_v18  ;;  %v683_v3 = vcombine.high %v4156_v63, %v4156_v63  ;;  %p3860_p10 = scmp.lt.s32.totalorder %s3195_s5, %s3858_s20  ;;  %p3861_p2 = scmp.lt.s32.totalorder %s3859_s24, %s3853_s11 }
  0x68   : > { %v409_v16 = vld [vmem:[%s4114_s25 + $0x540] sm:$0xff]  ;;  %v3350_v20 = vcombine.high %v281_v13, %v285_v15  ;;  %2684 = vmatprep.subr.bf16.mxu1 %v3486_v14  ;;  %v3349_v26 = vcombine.low %v281_v13, %v285_v15  ;;  %p3856_p0 = pneg %p3855_p12 }
  0x69   : > { %v413_v17 = vld [vmem:[%s4114_s25 + $0x560] sm:$0xff]  ;;  %2685 = vmatpush1.bf16.msra.mxu1 %v3485_v19  ;;  %v4165_v9 = vrot.slane %v683_v3, %v4149_v53  ;;  %v668_v19 = vcombine.high %v240_v59, %v240_v59  ;;  %p3862_p13 = por %p3861_p2, %p3860_p10 }
  0x6a   : > { %v3478_v21 = vcombine.high %v409_v16, %v413_v17  ;;  %v273_v22 = vld [vmem:[%s4114_s25 + $0x100] sm:$0xff]  ;;  %2645 = vmatprep.subr.bf16.mxu0 %v3350_v20  ;;  %v3477_v27 = vcombine.low %v409_v16, %v413_v17 }
  0x6b   : > { %v277_v23 = vld [vmem:[%s4114_s25 + $0x120] sm:$0xff]  ;;  %2646 = vmatpush1.bf16.msra.mxu0 %v3349_v26  ;;  %2673 = vmatprep.mubr.bf16.mxu0 %v4165_v9  ;;  %v4172_v13 = vcombine.high %v4165_v9, %v4165_v9  ;;  %p3863_p1 = pnand %p3862_p13, %p3856_p0 }
  0x6c   : > { %v401_v24 = vld [vmem:[%s4114_s25 + $0x500] sm:$0xff]  ;;  %v3342_v28 = vcombine.high %v273_v22, %v277_v23  ;;  %2686 = vmatprep.subr.bf16.mxu1 %v3478_v21  ;;  %v3341_v37 = vcombine.low %v273_v22, %v277_v23 }
  0x6d   : > { %v405_v25 = vld [vmem:[%s4114_s25 + $0x520] sm:$0xff]  ;;  %2687 = vmatpush1.bf16.msra.mxu1 %v3477_v27  ;;  %2714 = vmatprep.mubr.bf16.mxu1 %v4172_v13 }
  0x6e   : > { %v3470_v29 = vcombine.high %v401_v24, %v405_v25  ;;  %v265_v30 = vld [vmem:[%s4114_s25 + $0xc0] sm:$0xff]  ;;  %2647 = vmatprep.subr.bf16.mxu0 %v3342_v28  ;;  %v3469_v38 = vcombine.low %v401_v24, %v405_v25  ;;  %v4182_v28 = vrot.slane %v668_v19, %v4149_v53  ;;  %v298_v19 = vld [vmem:[%s4114_s25 + $0x1c8] sm:$0xff] }
  0x6f   : > { %v269_v31 = vld [vmem:[%s4114_s25 + $0xe0] sm:$0xff]  ;;  %2648 = vmatpush1.bf16.msra.mxu0 %v3341_v37 }
  0x70   : > { %v393_v35 = vld [vmem:[%s4114_s25 + $0x4c0] sm:$0xff]  ;;  %v3334_v39 = vcombine.high %v265_v30, %v269_v31  ;;  %2688 = vmatprep.subr.bf16.mxu1 %v3470_v29  ;;  %v3333_v47 = vcombine.low %v265_v30, %v269_v31  ;;  %v4188_v32 = vrot.slane %v4182_v28, %v4149_v53 }
  0x71   : > { %v397_v36 = vld [vmem:[%s4114_s25 + $0x4e0] sm:$0xff]  ;;  %2689 = vmatpush1.bf16.msra.mxu1 %v3469_v38 }
  0x72   : > { %v3462_v40 = vcombine.high %v393_v35, %v397_v36  ;;  %v257_v41 = vld [vmem:[%s4114_s25 + $0x80] sm:$0xff]  ;;  %2649 = vmatprep.subr.bf16.mxu0 %v3334_v39  ;;  %v3461_v48 = vcombine.low %v393_v35, %v397_v36 }
  0x73   : > { %v261_v42 = vld [vmem:[%s4114_s25 + $0xa0] sm:$0xff]  ;;  %2650 = vmatpush1.bf16.msra.mxu0 %v3333_v47 }
  0x74   : > { %v385_v45 = vld [vmem:[%s4114_s25 + $0x480] sm:$0xff]  ;;  %v3326_v49 = vcombine.high %v257_v41, %v261_v42  ;;  %2690 = vmatprep.subr.bf16.mxu1 %v3462_v40  ;;  %v3325_v56 = vcombine.low %v257_v41, %v261_v42 }
  0x75   : > { %v389_v46 = vld [vmem:[%s4114_s25 + $0x4a0] sm:$0xff]  ;;  %2691 = vmatpush1.bf16.msra.mxu1 %v3461_v48 }
  0x76   : > { %v3454_v50 = vcombine.high %v385_v45, %v389_v46  ;;  %v249_v51 = vld [vmem:[%s4114_s25 + $0x40] sm:$0xff]  ;;  %2651 = vmatprep.subr.bf16.mxu0 %v3326_v49  ;;  %v3453_v57 = vcombine.low %v385_v45, %v389_v46 }
  0x77   : > { %v253_v52 = vld [vmem:[%s4114_s25 + $0x60] sm:$0xff]  ;;  %2652 = vmatpush1.bf16.msra.mxu0 %v3325_v56 }
  0x78   : > { %v377_v54 = vld [vmem:[%s4114_s25 + $0x440] sm:$0xff]  ;;  %v3318_v58 = vcombine.high %v249_v51, %v253_v52  ;;  %2692 = vmatprep.subr.bf16.mxu1 %v3454_v50  ;;  %v3317_v2 = vcombine.low %v249_v51, %v253_v52 }
  0x79   : > { %v381_v55 = vld [vmem:[%s4114_s25 + $0x460] sm:$0xff]  ;;  %2693 = vmatpush1.bf16.msra.mxu1 %v3453_v57 }
  0x7a   : > { %v3446_v60 = vcombine.high %v377_v54, %v381_v55  ;;  %v241_v61 = vld [vmem:[%s4114_s25] sm:$0xff]  ;;  %2653 = vmatprep.subr.bf16.mxu0 %v3318_v58  ;;  %v3445_v4 = vcombine.low %v377_v54, %v381_v55 }
  0x7b   : > { %v245_v62 = vld [vmem:[%s4114_s25 + $0x20] sm:$0xff]  ;;  %2654 = vmatpush1.bf16.msra.mxu0 %v3317_v2 }
  0x7c   : > { %v369_v0 = vld [vmem:[%s4114_s25 + $0x400] sm:$0xff]  ;;  %v3310_v5 = vcombine.high %v241_v61, %v245_v62  ;;  %2694 = vmatprep.subr.bf16.mxu1 %v3446_v60  ;;  %v3309_v12 = vcombine.low %v241_v61, %v245_v62 }
  0x7d   : > { %v373_v1 = vld [vmem:[%s4114_s25 + $0x420] sm:$0xff]  ;;  %2695 = vmatpush1.bf16.msra.mxu1 %v3445_v4 }
  0x7e   : > { %v3438_v6 = vcombine.high %v369_v0, %v373_v1  ;;  %v361_v7 = vld [vmem:[%s4114_s25 + $0x3c0] sm:$0xff]  ;;  %2655 = vmatprep.subr.bf16.mxu0 %v3310_v5  ;;  %v3437_v14 = vcombine.low %v369_v0, %v373_v1 }
  0x7f   : > { %v365_v8 = vld [vmem:[%s4114_s25 + $0x3e0] sm:$0xff]  ;;  %2656 = vmatpush1.bf16.msra.mxu0 %v3309_v12 }
  0x80   : > { %v489_v10 = vld [vmem:[%s4114_s25 + $0x7c0] sm:$0xff]  ;;  %v3430_v15 = vcombine.high %v361_v7, %v365_v8  ;;  %2696 = vmatprep.subr.bf16.mxu1 %v3438_v6  ;;  %v3429_v22 = vcombine.low %v361_v7, %v365_v8 }
  0x81   : > { %v493_v11 = vld [vmem:[%s4114_s25 + $0x7e0] sm:$0xff]  ;;  %2697 = vmatpush1.bf16.msra.mxu1 %v3437_v14 }
  0x82   : > { %v3558_v16 = vcombine.high %v489_v10, %v493_v11  ;;  %v353_v17 = vld [vmem:[%s4114_s25 + $0x380] sm:$0xff]  ;;  %2657 = vmatprep.subr.bf16.mxu0 %v3430_v15  ;;  %v3557_v23 = vcombine.low %v489_v10, %v493_v11 }
  0x83   : > { %v357_v18 = vld [vmem:[%s4114_s25 + $0x3a0] sm:$0xff]  ;;  %2658 = vmatpush2.bf16.msra.mxu0 %v3429_v22  ;;  %v4216_v22 = vrot.slane %v4156_v63, %v4149_v53 }
  0x84   : > { %v481_v20 = vld [vmem:[%s4114_s25 + $0x780] sm:$0xff]  ;;  %v3422_v24 = vcombine.high %v353_v17, %v357_v18  ;;  %2698 = vmatprep.subr.bf16.mxu1 %v3558_v16  ;;  %v3421_v31 = vcombine.low %v353_v17, %v357_v18 }
  0x85   : > { %v485_v21 = vld [vmem:[%s4114_s25 + $0x7a0] sm:$0xff]  ;;  %2699 = vmatpush2.bf16.msra.mxu1 %v3557_v23  ;;  %v4226_v63 = vcombine.high %v4216_v22, %v4216_v22 }
  0x86   : > { %v3550_v25 = vcombine.high %v481_v20, %v485_v21  ;;  %v345_v26 = vld [vmem:[%s4114_s25 + $0x340] sm:$0xff]  ;;  %2659 = vmatprep.subr.bf16.mxu0 %v3422_v24  ;;  %v3549_v33 = vcombine.low %v481_v20, %v485_v21  ;;  %v302_v20 = vld [vmem:[%s4114_s25 + $0x1e8] sm:$0xff] }
  0x87   : > { %v349_v27 = vld [vmem:[%s4114_s25 + $0x360] sm:$0xff]  ;;  %2660 = vmatpush2.bf16.msra.mxu0 %v3421_v31  ;;  %v294_v31 = vld [vmem:[%s4114_s25 + $0x1a8] sm:$0xff] }
  0x88   : > { %v473_v29 = vld [vmem:[%s4114_s25 + $0x740] sm:$0xff]  ;;  %v3414_v34 = vcombine.high %v345_v26, %v349_v27  ;;  %2700 = vmatprep.subr.bf16.mxu1 %v3550_v25  ;;  %v3413_v40 = vcombine.low %v345_v26, %v349_v27  ;;  %v3368_v25 = vcombine.high %v298_v19, %v302_v20 }
  0x89   : > { %v477_v30 = vld [vmem:[%s4114_s25 + $0x760] sm:$0xff]  ;;  %2701 = vmatpush2.bf16.msra.mxu1 %v3549_v33 }
  0x8a   : > { %v3542_v35 = vcombine.high %v473_v29, %v477_v30  ;;  %v337_v36 = vld [vmem:[%s4114_s25 + $0x300] sm:$0xff]  ;;  %2661 = vmatprep.subr.bf16.mxu0 %v3414_v34  ;;  %v3541_v41 = vcombine.low %v473_v29, %v477_v30  ;;  %v684_v29 = vcombine.high %v4182_v28, %v4182_v28  ;;  %v290_v30 = vld [vmem:[%s4114_s25 + $0x188] sm:$0xff]  ;;  %v3367_v34 = vcombine.low %v298_v19, %v302_v20 }
  0x8b   : > { %v341_v37 = vld [vmem:[%s4114_s25 + $0x320] sm:$0xff]  ;;  %2662 = vmatpush2.bf16.msra.mxu0 %v3413_v40  ;;  %v286_v40 = vld [vmem:[%s4114_s25 + $0x168] sm:$0xff] }
  0x8c   : > { %v465_v38 = vld [vmem:[%s4114_s25 + $0x700] sm:$0xff]  ;;  %v3406_v42 = vcombine.high %v337_v36, %v341_v37  ;;  %2702 = vmatprep.subr.bf16.mxu1 %v3542_v35  ;;  %v3405_v49 = vcombine.low %v337_v36, %v341_v37  ;;  %v3360_v36 = vcombine.high %v290_v30, %v294_v31  ;;  %v242_v19 = vld [vmem:[%s4114_s25 + $0x8] sm:$0xff] }
  0x8d   : > { %v469_v39 = vld [vmem:[%s4114_s25 + $0x720] sm:$0xff]  ;;  %2703 = vmatpush2.bf16.msra.mxu1 %v3541_v41  ;;  %v246_v20 = vld [vmem:[%s4114_s25 + $0x28] sm:$0xff] }
  0x8e   : > { %v3534_v44 = vcombine.high %v465_v38, %v469_v39  ;;  %v329_v45 = vld [vmem:[%s4114_s25 + $0x2c0] sm:$0xff]  ;;  %2663 = vmatprep.subr.bf16.mxu0 %v3406_v42  ;;  %v3533_v50 = vcombine.low %v465_v38, %v469_v39  ;;  %v4231_v38 = vrot.slane %v684_v29, %v4149_v53  ;;  %v282_v39 = vld [vmem:[%s4114_s25 + $0x148] sm:$0xff]  ;;  %v3359_v42 = vcombine.low %v290_v30, %v294_v31 }
  0x8f   : > { %v333_v46 = vld [vmem:[%s4114_s25 + $0x2e0] sm:$0xff]  ;;  %2664 = vmatpush2.bf16.msra.mxu0 %v3405_v49  ;;  %v362_v29 = vld [vmem:[%s4114_s25 + $0x3c8] sm:$0xff] }
  0x90   : > { %v457_v47 = vld [vmem:[%s4114_s25 + $0x6c0] sm:$0xff]  ;;  %v3398_v51 = vcombine.high %v329_v45, %v333_v46  ;;  %2704 = vmatprep.subr.bf16.mxu1 %v3534_v44  ;;  %v3397_v58 = vcombine.low %v329_v45, %v333_v46  ;;  %v3352_v45 = vcombine.high %v282_v39, %v286_v40  ;;  %v366_v30 = vld [vmem:[%s4114_s25 + $0x3e8] sm:$0xff] }
  0x91   : > { %v461_v48 = vld [vmem:[%s4114_s25 + $0x6e0] sm:$0xff]  ;;  %2705 = vmatpush2.bf16.msra.mxu1 %v3533_v50  ;;  %v3351_v50 = vcombine.low %v282_v39, %v286_v40  ;;  %v358_v39 = vld [vmem:[%s4114_s25 + $0x3a8] sm:$0xff] }
  0x92   : > { %v3526_v52 = vcombine.high %v457_v47, %v461_v48  ;;  %v321_v54 = vld [vmem:[%s4114_s25 + $0x280] sm:$0xff]  ;;  %2665 = vmatprep.subr.bf16.mxu0 %v3398_v51  ;;  %v3525_v59 = vcombine.low %v457_v47, %v461_v48  ;;  %v274_v47 = vld [vmem:[%s4114_s25 + $0x108] sm:$0xff] }
  0x93   : > { %v325_v55 = vld [vmem:[%s4114_s25 + $0x2a0] sm:$0xff]  ;;  %2666 = vmatpush2.bf16.msra.mxu0 %v3397_v58  ;;  %v278_v48 = vld [vmem:[%s4114_s25 + $0x128] sm:$0xff] }
  0x94   : > { %v449_v56 = vld [vmem:[%s4114_s25 + $0x680] sm:$0xff]  ;;  %v3390_v60 = vcombine.high %v321_v54, %v325_v55  ;;  %2706 = vmatprep.subr.bf16.mxu1 %v3526_v52  ;;  %v3389_v3 = vcombine.low %v321_v54, %v325_v55  ;;  %v3344_v52 = vcombine.high %v274_v47, %v278_v48 }
  0x95   : > { %v453_v57 = vld [vmem:[%s4114_s25 + $0x6a0] sm:$0xff]  ;;  %2707 = vmatpush2.bf16.msra.mxu1 %v3525_v59  ;;  %v3343_v59 = vcombine.low %v274_v47, %v278_v48  ;;  %v350_v47 = vld [vmem:[%s4114_s25 + $0x368] sm:$0xff] }
  0x96   : > { %v3518_v61 = vcombine.high %v449_v56, %v453_v57  ;;  %v313_v62 = vld [vmem:[%s4114_s25 + $0x240] sm:$0xff]  ;;  %2667 = vmatprep.subr.bf16.mxu0 %v3390_v60  ;;  %v3517_v4 = vcombine.low %v449_v56, %v453_v57  ;;  %v266_v56 = vld [vmem:[%s4114_s25 + $0xc8] sm:$0xff] }
  0x97   : > { %v317_v0 = vld [vmem:[%s4114_s25 + $0x260] sm:$0xff]  ;;  %2668 = vmatpush2.bf16.msra.mxu0 %v3389_v3  ;;  %v270_v57 = vld [vmem:[%s4114_s25 + $0xe8] sm:$0xff] }
  0x98   : > { %v441_v1 = vld [vmem:[%s4114_s25 + $0x640] sm:$0xff]  ;;  %v3382_v5 = vcombine.high %v313_v62, %v317_v0  ;;  %2708 = vmatprep.subr.bf16.mxu1 %v3518_v61  ;;  %v3381_v12 = vcombine.low %v313_v62, %v317_v0  ;;  %v3336_v61 = vcombine.high %v266_v56, %v270_v57 }
  0x99   : > { %v445_v2 = vld [vmem:[%s4114_s25 + $0x660] sm:$0xff]  ;;  %2709 = vmatpush2.bf16.msra.mxu1 %v3517_v4  ;;  %v3335_v4 = vcombine.low %v266_v56, %v270_v57  ;;  %v342_v56 = vld [vmem:[%s4114_s25 + $0x328] sm:$0xff] }
  0x9a   : > { %v3510_v6 = vcombine.high %v441_v1, %v445_v2  ;;  %v305_v7 = vld [vmem:[%s4114_s25 + $0x200] sm:$0xff]  ;;  %2669 = vmatprep.subr.bf16.mxu0 %v3382_v5  ;;  %v3509_v14 = vcombine.low %v441_v1, %v445_v2  ;;  %v258_v1 = vld [vmem:[%s4114_s25 + $0x88] sm:$0xff] }
  0x9b   : > { %v309_v8 = vld [vmem:[%s4114_s25 + $0x220] sm:$0xff]  ;;  %2670 = vmatpush2.bf16.msra.mxu0 %v3381_v12  ;;  %v262_v2 = vld [vmem:[%s4114_s25 + $0xa8] sm:$0xff] }
  0x9c   : > { %v433_v10 = vld [vmem:[%s4114_s25 + $0x600] sm:$0xff]  ;;  %v3374_v15 = vcombine.high %v305_v7, %v309_v8  ;;  %2710 = vmatprep.subr.bf16.mxu1 %v3510_v6  ;;  %v3373_v21 = vcombine.low %v305_v7, %v309_v8  ;;  %v3328_v6 = vcombine.high %v258_v1, %v262_v2 }
  0x9d   : > { %v437_v11 = vld [vmem:[%s4114_s25 + $0x620] sm:$0xff]  ;;  %2711 = vmatpush2.bf16.msra.mxu1 %v3509_v14  ;;  %v3327_v14 = vcombine.low %v258_v1, %v262_v2  ;;  %v334_v1 = vld [vmem:[%s4114_s25 + $0x2e8] sm:$0xff] }
  0x9e   : > { %v3502_v16 = vcombine.high %v433_v10, %v437_v11  ;;  %v553_v17 = vld [vmem:[%s4114_s25 + $0x9c0] sm:$0xff]  ;;  %2671 = vmatprep.subr.bf16.mxu0 %v3374_v15  ;;  %v3501_v23 = vcombine.low %v433_v10, %v437_v11  ;;  %v250_v10 = vld [vmem:[%s4114_s25 + $0x48] sm:$0xff] }
  0x9f   : > { %v557_v18 = vld [vmem:[%s4114_s25 + $0x9e0] sm:$0xff]  ;;  %2672 = vmatpush2.bf16.msra.mxu0 %v3373_v21  ;;  %v254_v11 = vld [vmem:[%s4114_s25 + $0x68] sm:$0xff] }
  0xa0   : > { %v3622_v24 = vcombine.high %v553_v17, %v557_v18  ;;  %2712 = vmatprep.subr.bf16.mxu1 %v3502_v16  ;;  %v545_v26 = vld [vmem:[%s4114_s25 + $0x980] sm:$0xff]  ;;  %v3621_v33 = vcombine.low %v553_v17, %v557_v18  ;;  %v3320_v16 = vcombine.high %v250_v10, %v254_v11 }
  0xa1   : > { %v549_v27 = vld [vmem:[%s4114_s25 + $0x9a0] sm:$0xff]  ;;  %2713 = vmatpush2.bf16.msra.mxu1 %v3501_v23  ;;  %v3319_v23 = vcombine.low %v250_v10, %v254_v11  ;;  %v326_v10 = vld [vmem:[%s4114_s25 + $0x2a8] sm:$0xff] }
  0xa2   : > { %2723 = vmatprep.subr.bf16.mxu0 %v3622_v24  ;;  %v3614_v35 = vcombine.high %v545_v26, %v549_v27  ;;  %2764 = vmatprep.subr.bf16.mxu1 %v3368_v25  ;;  %v537_v37 = vld [vmem:[%s4114_s25 + $0x940] sm:$0xff]  ;;  %v3613_v41 = vcombine.low %v545_v26, %v549_v27  ;;  %v3312_v25 = vcombine.high %v242_v19, %v246_v20 }
  0xa3   : > { %v541_v28 = vld [vmem:[%s4114_s25 + $0x960] sm:$0xff]  ;;  %2674 = vmatmul.mubr.bf16.vlgmr.msra.gmra.mxu0 %v4216_v22 }
  0xa4   : > { %2715 = vmatmul.mubr.bf16.vlgmr.msra.gmra.mxu1 %v4226_v63  ;;  %2724 = vmatpush1.bf16.msra.mxu0 %v3621_v33  ;;  %v3606_v44 = vcombine.high %v537_v37, %v541_v28  ;;  %v529_v53 = vld [vmem:[%s4114_s25 + $0x900] sm:$0xff]  ;;  %v3605_v49 = vcombine.low %v537_v37, %v541_v28  ;;  %v3311_v33 = vcombine.low %v242_v19, %v246_v20  ;;  %v354_v28 = vld [vmem:[%s4114_s25 + $0x388] sm:$0xff] }
  0xa5   : > { %2765 = vmatpush1.bf16.msra.mxu1 %v3367_v34  ;;  %2725 = vmatprep.subr.bf16.mxu0 %v3614_v35  ;;  %v533_v46 = vld [vmem:[%s4114_s25 + $0x920] sm:$0xff]  ;;  %v3432_v35 = vcombine.high %v362_v29, %v366_v30  ;;  %v318_v19 = vld [vmem:[%s4114_s25 + $0x268] sm:$0xff] }
  0xa6   : > { %2766 = vmatprep.subr.bf16.mxu1 %v3360_v36  ;;  %2755 = vmatprep.mubr.bf16.mxu0 %v4231_v38  ;;  %v3598_v51 = vcombine.high %v529_v53, %v533_v46  ;;  %v521_v54 = vld [vmem:[%s4114_s25 + $0x8c0] sm:$0xff]  ;;  %v3597_v58 = vcombine.low %v529_v53, %v533_v46  ;;  %v346_v46 = vld [vmem:[%s4114_s25 + $0x348] sm:$0xff] }
  0xa7   : > { %2796 = vmatprep.mubr.bf16.mxu1 %v4165_v9  ;;  %v525_v55 = vld [vmem:[%s4114_s25 + $0x8e0] sm:$0xff] }
  0xa8   : > { %2726 = vmatpush1.bf16.msra.mxu0 %v3613_v41  ;;  %v3590_v60 = vcombine.high %v521_v54, %v525_v55  ;;  %v513_v62 = vld [vmem:[%s4114_s25 + $0x880] sm:$0xff]  ;;  %v3589_v3 = vcombine.low %v521_v54, %v525_v55  ;;  %v3431_v41 = vcombine.low %v362_v29, %v366_v30  ;;  %v338_v55 = vld [vmem:[%s4114_s25 + $0x308] sm:$0xff] }
  0xa9   : > { %2767 = vmatpush1.bf16.msra.mxu1 %v3359_v42  ;;  %2727 = vmatprep.subr.bf16.mxu0 %v3606_v44  ;;  %v517_v0 = vld [vmem:[%s4114_s25 + $0x8a0] sm:$0xff]  ;;  %v3424_v44 = vcombine.high %v354_v28, %v358_v39  ;;  %v310_v29 = vld [vmem:[%s4114_s25 + $0x228] sm:$0xff] }
  0xaa   : > { %2768 = vmatprep.subr.bf16.mxu1 %v3352_v45  ;;  %v3582_v5 = vcombine.high %v513_v62, %v517_v0  ;;  %v505_v7 = vld [vmem:[%s4114_s25 + $0x840] sm:$0xff]  ;;  %v3581_v12 = vcombine.low %v513_v62, %v517_v0  ;;  %v330_v0 = vld [vmem:[%s4114_s25 + $0x2c8] sm:$0xff] }
  0xab   : > { %v509_v8 = vld [vmem:[%s4114_s25 + $0x860] sm:$0xff] }
  0xac   : > { %2728 = vmatpush1.bf16.msra.mxu0 %v3605_v49  ;;  %v3574_v15 = vcombine.high %v505_v7, %v509_v8  ;;  %v497_v17 = vld [vmem:[%s4114_s25 + $0x800] sm:$0xff]  ;;  %v3573_v21 = vcombine.low %v505_v7, %v509_v8  ;;  %v3423_v49 = vcombine.low %v354_v28, %v358_v39  ;;  %v322_v8 = vld [vmem:[%s4114_s25 + $0x288] sm:$0xff] }
  0xad   : > { %2769 = vmatpush1.bf16.msra.mxu1 %v3351_v50  ;;  %2729 = vmatprep.subr.bf16.mxu0 %v3598_v51  ;;  %v501_v18 = vld [vmem:[%s4114_s25 + $0x820] sm:$0xff]  ;;  %v3416_v51 = vcombine.high %v346_v46, %v350_v47  ;;  %v558_v28 = vld [vmem:[%s4114_s25 + $0x9e8] sm:$0xff] }
  0xae   : > { %2770 = vmatprep.subr.bf16.mxu1 %v3344_v52  ;;  %v3566_v24 = vcombine.high %v497_v17, %v501_v18  ;;  %v617_v26 = vld [vmem:[%s4114_s25 + $0xbc0] sm:$0xff]  ;;  %v3565_v31 = vcombine.low %v497_v17, %v501_v18  ;;  %v314_v18 = vld [vmem:[%s4114_s25 + $0x248] sm:$0xff] }
  0xaf   : > { %v621_v27 = vld [vmem:[%s4114_s25 + $0xbe0] sm:$0xff] }
  0xb0   : > { %2730 = vmatpush1.bf16.msra.mxu0 %v3597_v58  ;;  %v3686_v34 = vcombine.high %v617_v26, %v621_v27  ;;  %v609_v36 = vld [vmem:[%s4114_s25 + $0xb80] sm:$0xff]  ;;  %v3685_v40 = vcombine.low %v617_v26, %v621_v27  ;;  %v3415_v58 = vcombine.low %v346_v46, %v350_v47  ;;  %v306_v27 = vld [vmem:[%s4114_s25 + $0x208] sm:$0xff] }
  0xb1   : > { %2771 = vmatpush1.bf16.msra.mxu1 %v3343_v59  ;;  %2731 = vmatprep.subr.bf16.mxu0 %v3590_v60  ;;  %v613_v37 = vld [vmem:[%s4114_s25 + $0xba0] sm:$0xff]  ;;  %v3408_v60 = vcombine.high %v338_v55, %v342_v56  ;;  %v550_v46 = vld [vmem:[%s4114_s25 + $0x9a8] sm:$0xff] }
  0xb2   : > { %2772 = vmatprep.subr.bf16.mxu1 %v3336_v61  ;;  %v3678_v42 = vcombine.high %v609_v36, %v613_v37  ;;  %v601_v45 = vld [vmem:[%s4114_s25 + $0xb40] sm:$0xff]  ;;  %v3677_v48 = vcombine.low %v609_v36, %v613_v37  ;;  %v430_v36 = vld [vmem:[%s4114_s25 + $0x5e8] sm:$0xff] }
  0xb3   : > { %v605_v53 = vld [vmem:[%s4114_s25 + $0xb60] sm:$0xff]  ;;  %v554_v37 = vld [vmem:[%s4114_s25 + $0x9c8] sm:$0xff] }
  0xb4   : > { %2732 = vmatpush1.bf16.msra.mxu0 %v3589_v3  ;;  %v3670_v50 = vcombine.high %v601_v45, %v605_v53  ;;  %v593_v52 = vld [vmem:[%s4114_s25 + $0xb00] sm:$0xff]  ;;  %v3669_v57 = vcombine.low %v601_v45, %v605_v53  ;;  %v3407_v3 = vcombine.low %v338_v55, %v342_v56  ;;  %v422_v45 = vld [vmem:[%s4114_s25 + $0x5a8] sm:$0xff] }
  0xb5   : > { %2773 = vmatpush1.bf16.msra.mxu1 %v3335_v4  ;;  %2733 = vmatprep.subr.bf16.mxu0 %v3582_v5  ;;  %v597_v54 = vld [vmem:[%s4114_s25 + $0xb20] sm:$0xff]  ;;  %v3400_v5 = vcombine.high %v330_v0, %v334_v1  ;;  %v546_v53 = vld [vmem:[%s4114_s25 + $0x988] sm:$0xff] }
  0xb6   : > { %2774 = vmatprep.subr.bf16.mxu1 %v3328_v6  ;;  %v3662_v59 = vcombine.high %v593_v52, %v597_v54  ;;  %v585_v61 = vld [vmem:[%s4114_s25 + $0xac0] sm:$0xff]  ;;  %v3661_v2 = vcombine.low %v593_v52, %v597_v54  ;;  %v414_v52 = vld [vmem:[%s4114_s25 + $0x568] sm:$0xff] }
  0xb7   : > { %v589_v62 = vld [vmem:[%s4114_s25 + $0xae0] sm:$0xff]  ;;  %v538_v54 = vld [vmem:[%s4114_s25 + $0x948] sm:$0xff] }
  0xb8   : > { %2734 = vmatpush1.bf16.msra.mxu0 %v3581_v12  ;;  %v3654_v4 = vcombine.high %v585_v61, %v589_v62  ;;  %v577_v6 = vld [vmem:[%s4114_s25 + $0xa80] sm:$0xff]  ;;  %v3653_v11 = vcombine.low %v585_v61, %v589_v62  ;;  %v3399_v12 = vcombine.low %v330_v0, %v334_v1  ;;  %v542_v55 = vld [vmem:[%s4114_s25 + $0x968] sm:$0xff] }
  0xb9   : > { %2775 = vmatpush1.bf16.msra.mxu1 %v3327_v14  ;;  %2735 = vmatprep.subr.bf16.mxu0 %v3574_v15  ;;  %v581_v7 = vld [vmem:[%s4114_s25 + $0xaa0] sm:$0xff]  ;;  %v3392_v15 = vcombine.high %v322_v8, %v326_v10  ;;  %v406_v61 = vld [vmem:[%s4114_s25 + $0x528] sm:$0xff] }
  0xba   : > { %2776 = vmatprep.subr.bf16.mxu1 %v3320_v16  ;;  %v3646_v14 = vcombine.high %v577_v6, %v581_v7  ;;  %v569_v16 = vld [vmem:[%s4114_s25 + $0xa40] sm:$0xff]  ;;  %v3645_v20 = vcombine.low %v577_v6, %v581_v7  ;;  %v530_v62 = vld [vmem:[%s4114_s25 + $0x908] sm:$0xff] }
  0xbb   : > { %v573_v17 = vld [vmem:[%s4114_s25 + $0xa60] sm:$0xff]  ;;  %v534_v0 = vld [vmem:[%s4114_s25 + $0x928] sm:$0xff] }
  0xbc   : > { %2736 = vmatpush1.bf16.msra.mxu0 %v3573_v21  ;;  %v3391_v21 = vcombine.low %v322_v8, %v326_v10  ;;  %v565_v26 = vld [vmem:[%s4114_s25 + $0xa20] sm:$0xff]  ;;  %v3637_v30 = vcombine.low %v569_v16, %v573_v17  ;;  %v398_v6 = vld [vmem:[%s4114_s25 + $0x4e8] sm:$0xff] }
  0xbd   : > { %2777 = vmatpush1.bf16.msra.mxu1 %v3319_v23  ;;  %2737 = vmatprep.subr.bf16.mxu0 %v3566_v24  ;;  %v3638_v23 = vcombine.high %v569_v16, %v573_v17  ;;  %v3384_v24 = vcombine.high %v314_v18, %v318_v19  ;;  %v522_v7 = vld [vmem:[%s4114_s25 + $0x8c8] sm:$0xff] }
  0xbe   : > { %2778 = vmatprep.subr.bf16.mxu1 %v3312_v25  ;;  %v561_v25 = vld [vmem:[%s4114_s25 + $0xa00] sm:$0xff]  ;;  %v526_v8 = vld [vmem:[%s4114_s25 + $0x8e8] sm:$0xff] }
  0xbf   : > { %v3629_v39 = vcombine.low %v561_v25, %v565_v26  ;;  %v390_v16 = vld [vmem:[%s4114_s25 + $0x4a8] sm:$0xff] }
  0xc0   : > { %2738 = vmatpush1.bf16.msra.mxu0 %v3565_v31  ;;  %v3383_v31 = vcombine.low %v314_v18, %v318_v19  ;;  %v514_v17 = vld [vmem:[%s4114_s25 + $0x888] sm:$0xff] }
  0xc1   : > { %2779 = vmatpush1.bf16.msra.mxu1 %v3311_v33  ;;  %2739 = vmatprep.subr.bf16.mxu0 %v3686_v34  ;;  %v3630_v33 = vcombine.high %v561_v25, %v565_v26  ;;  %v3376_v34 = vcombine.high %v306_v27, %v310_v29  ;;  %v518_v18 = vld [vmem:[%s4114_s25 + $0x8a8] sm:$0xff] }
  0xc2   : > { %2780 = vmatprep.subr.bf16.mxu1 %v3432_v35  ;;  %v426_v35 = vld [vmem:[%s4114_s25 + $0x5c8] sm:$0xff] }
  0xc3   : > { %v3495_v47 = vcombine.low %v426_v35, %v430_v36  ;;  %v382_v25 = vld [vmem:[%s4114_s25 + $0x468] sm:$0xff] }
  0xc4   : > { %2740 = vmatpush2.bf16.msra.mxu0 %v3685_v40  ;;  %v3375_v40 = vcombine.low %v306_v27, %v310_v29  ;;  %v506_v26 = vld [vmem:[%s4114_s25 + $0x848] sm:$0xff] }
  0xc5   : > { %2781 = vmatpush2.bf16.msra.mxu1 %v3431_v41  ;;  %2741 = vmatprep.subr.bf16.mxu0 %v3678_v42  ;;  %v3496_v41 = vcombine.high %v426_v35, %v430_v36  ;;  %v3624_v42 = vcombine.high %v554_v37, %v558_v28  ;;  %v510_v27 = vld [vmem:[%s4114_s25 + $0x868] sm:$0xff] }
  0xc6   : > { %2782 = vmatprep.subr.bf16.mxu1 %v3424_v44  ;;  %v418_v44 = vld [vmem:[%s4114_s25 + $0x588] sm:$0xff] }
  0xc7   : > { %v3487_v56 = vcombine.low %v418_v44, %v422_v45  ;;  %v374_v35 = vld [vmem:[%s4114_s25 + $0x428] sm:$0xff] }
  0xc8   : > { %2742 = vmatpush2.bf16.msra.mxu0 %v3677_v48  ;;  %v3623_v48 = vcombine.low %v554_v37, %v558_v28  ;;  %v498_v36 = vld [vmem:[%s4114_s25 + $0x808] sm:$0xff] }
  0xc9   : > { %2783 = vmatpush2.bf16.msra.mxu1 %v3423_v49  ;;  %2743 = vmatprep.subr.bf16.mxu0 %v3670_v50  ;;  %v3488_v49 = vcombine.high %v418_v44, %v422_v45  ;;  %v3616_v50 = vcombine.high %v546_v53, %v550_v46  ;;  %v502_v37 = vld [vmem:[%s4114_s25 + $0x828] sm:$0xff] }
  0xca   : > { %2784 = vmatprep.subr.bf16.mxu1 %v3416_v51  ;;  %v410_v51 = vld [vmem:[%s4114_s25 + $0x548] sm:$0xff] }
  0xcb   : > { %v3479_v1 = vcombine.low %v410_v51, %v414_v52  ;;  %v494_v44 = vld [vmem:[%s4114_s25 + $0x7e8] sm:$0xff] }
  0xcc   : > { %2744 = vmatpush2.bf16.msra.mxu0 %v3669_v57  ;;  %v3615_v57 = vcombine.low %v546_v53, %v550_v46  ;;  %v618_v45 = vld [vmem:[%s4114_s25 + $0xbc8] sm:$0xff] }
  0xcd   : > { %2785 = vmatpush2.bf16.msra.mxu1 %v3415_v58  ;;  %2745 = vmatprep.subr.bf16.mxu0 %v3662_v59  ;;  %v3480_v58 = vcombine.high %v410_v51, %v414_v52  ;;  %v3608_v59 = vcombine.high %v538_v54, %v542_v55  ;;  %v622_v53 = vld [vmem:[%s4114_s25 + $0xbe8] sm:$0xff] }
  0xce   : > { %2786 = vmatprep.subr.bf16.mxu1 %v3408_v60  ;;  %v402_v60 = vld [vmem:[%s4114_s25 + $0x508] sm:$0xff] }
  0xcf   : > { %v3471_v10 = vcombine.low %v402_v60, %v406_v61  ;;  %v486_v51 = vld [vmem:[%s4114_s25 + $0x7a8] sm:$0xff] }
  0xd0   : > { %2746 = vmatpush2.bf16.msra.mxu0 %v3661_v2  ;;  %v3607_v2 = vcombine.low %v538_v54, %v542_v55  ;;  %v610_v52 = vld [vmem:[%s4114_s25 + $0xb88] sm:$0xff] }
  0xd1   : > { %2787 = vmatpush2.bf16.msra.mxu1 %v3407_v3  ;;  %2747 = vmatprep.subr.bf16.mxu0 %v3654_v4  ;;  %v3472_v3 = vcombine.high %v402_v60, %v406_v61  ;;  %v3600_v4 = vcombine.high %v530_v62, %v534_v0  ;;  %v614_v54 = vld [vmem:[%s4114_s25 + $0xba8] sm:$0xff] }
  0xd2   : > { %2788 = vmatprep.subr.bf16.mxu1 %v3400_v5  ;;  %v394_v5 = vld [vmem:[%s4114_s25 + $0x4c8] sm:$0xff] }
  0xd3   : > { %v3463_v19 = vcombine.low %v394_v5, %v398_v6  ;;  %v478_v60 = vld [vmem:[%s4114_s25 + $0x768] sm:$0xff] }
  0xd4   : > { %2748 = vmatpush2.bf16.msra.mxu0 %v3653_v11  ;;  %v3599_v11 = vcombine.low %v530_v62, %v534_v0  ;;  %v602_v61 = vld [vmem:[%s4114_s25 + $0xb48] sm:$0xff] }
  0xd5   : > { %2789 = vmatpush2.bf16.msra.mxu1 %v3399_v12  ;;  %2749 = vmatprep.subr.bf16.mxu0 %v3646_v14  ;;  %v3464_v12 = vcombine.high %v394_v5, %v398_v6  ;;  %v3592_v14 = vcombine.high %v522_v7, %v526_v8  ;;  %v606_v62 = vld [vmem:[%s4114_s25 + $0xb68] sm:$0xff] }
  0xd6   : > { %2790 = vmatprep.subr.bf16.mxu1 %v3392_v15  ;;  %v386_v15 = vld [vmem:[%s4114_s25 + $0x488] sm:$0xff] }
  0xd7   : > { %v3455_v29 = vcombine.low %v386_v15, %v390_v16  ;;  %v470_v5 = vld [vmem:[%s4114_s25 + $0x728] sm:$0xff] }
  0xd8   : > { %2750 = vmatpush2.bf16.msra.mxu0 %v3645_v20  ;;  %v3591_v20 = vcombine.low %v522_v7, %v526_v8  ;;  %v594_v6 = vld [vmem:[%s4114_s25 + $0xb08] sm:$0xff] }
  0xd9   : > { %2791 = vmatpush2.bf16.msra.mxu1 %v3391_v21  ;;  %2751 = vmatprep.subr.bf16.mxu0 %v3638_v23  ;;  %v3456_v21 = vcombine.high %v386_v15, %v390_v16  ;;  %v3584_v23 = vcombine.high %v514_v17, %v518_v18  ;;  %v598_v7 = vld [vmem:[%s4114_s25 + $0xb28] sm:$0xff] }
  0xda   : > { %2792 = vmatprep.subr.bf16.mxu1 %v3384_v24  ;;  %v378_v24 = vld [vmem:[%s4114_s25 + $0x448] sm:$0xff] }
  0xdb   : > { %v3447_v28 = vcombine.low %v378_v24, %v382_v25  ;;  %v462_v15 = vld [vmem:[%s4114_s25 + $0x6e8] sm:$0xff] }
  0xdc   : > { %2752 = vmatpush2.bf16.msra.mxu0 %v3637_v30  ;;  %v3583_v30 = vcombine.low %v514_v17, %v518_v18  ;;  %v586_v16 = vld [vmem:[%s4114_s25 + $0xac8] sm:$0xff] }
  0xdd   : > { %2793 = vmatpush2.bf16.msra.mxu1 %v3383_v31  ;;  %2753 = vmatprep.subr.bf16.mxu0 %v3630_v33  ;;  %v3448_v31 = vcombine.high %v378_v24, %v382_v25  ;;  %v3576_v33 = vcombine.high %v506_v26, %v510_v27  ;;  %v590_v17 = vld [vmem:[%s4114_s25 + $0xae8] sm:$0xff] }
  0xde   : > { %2794 = vmatprep.subr.bf16.mxu1 %v3376_v34  ;;  %v370_v34 = vld [vmem:[%s4114_s25 + $0x408] sm:$0xff] }
  0xdf   : > { %v3439_v46 = vcombine.low %v370_v34, %v374_v35  ;;  %v454_v24 = vld [vmem:[%s4114_s25 + $0x6a8] sm:$0xff] }
  0xe0   : > { %2754 = vmatpush2.bf16.msra.mxu0 %v3629_v39  ;;  %v3575_v39 = vcombine.low %v506_v26, %v510_v27  ;;  %v578_v25 = vld [vmem:[%s4114_s25 + $0xa88] sm:$0xff] }
  0xe1   : > { %2795 = vmatpush2.bf16.msra.mxu1 %v3375_v40  ;;  %2805 = vmatprep.subr.bf16.mxu0 %v3496_v41  ;;  %v3440_v40 = vcombine.high %v370_v34, %v374_v35  ;;  %v3568_v41 = vcombine.high %v498_v36, %v502_v37  ;;  %v582_v26 = vld [vmem:[%s4114_s25 + $0xaa8] sm:$0xff] }
  0xe2   : > { %2846 = vmatprep.subr.bf16.mxu1 %v3624_v42  ;;  %v490_v42 = vld [vmem:[%s4114_s25 + $0x7c8] sm:$0xff] }
  0xe3   : > { %2756 = vmatmul.mubr.bf16.vlgmr.msra.gmra.mxu0 %v4188_v32  ;;  %v3559_v55 = vcombine.low %v490_v42, %v494_v44  ;;  %v446_v34 = vld [vmem:[%s4114_s25 + $0x668] sm:$0xff] }
  0xe4   : > { %2797 = vmatmul.mubr.bf16.vlgmr.msra.gmra.mxu1 %v4216_v22  ;;  %2806 = vmatpush1.bf16.msra.mxu0 %v3495_v47  ;;  %v3567_v47 = vcombine.low %v498_v36, %v502_v37  ;;  %v570_v35 = vld [vmem:[%s4114_s25 + $0xa48] sm:$0xff] }
  0xe5   : > { %2847 = vmatpush1.bf16.msra.mxu1 %v3623_v48  ;;  %2807 = vmatprep.subr.bf16.mxu0 %v3488_v49  ;;  %v3560_v48 = vcombine.high %v490_v42, %v494_v44  ;;  %v3688_v49 = vcombine.high %v618_v45, %v622_v53  ;;  %v574_v36 = vld [vmem:[%s4114_s25 + $0xa68] sm:$0xff] }
  0xe6   : > { %2848 = vmatprep.subr.bf16.mxu1 %v3616_v50  ;;  %2837 = vmatprep.mubr.bf16.mxu0 %v4172_v13  ;;  %v482_v50 = vld [vmem:[%s4114_s25 + $0x788] sm:$0xff] }
  0xe7   : > { %2878 = vmatprep.mubr.bf16.mxu1 %v4231_v38  ;;  %v3551_v0 = vcombine.low %v482_v50, %v486_v51  ;;  %v438_v42 = vld [vmem:[%s4114_s25 + $0x628] sm:$0xff] }
  0xe8   : > { %2808 = vmatpush1.bf16.msra.mxu0 %v3487_v56  ;;  %v3687_v56 = vcombine.low %v618_v45, %v622_v53  ;;  %v562_v44 = vld [vmem:[%s4114_s25 + $0xa08] sm:$0xff] }
  0xe9   : > { %2849 = vmatpush1.bf16.msra.mxu1 %v3615_v57  ;;  %2809 = vmatprep.subr.bf16.mxu0 %v3480_v58  ;;  %v3552_v57 = vcombine.high %v482_v50, %v486_v51  ;;  %v3680_v58 = vcombine.high %v610_v52, %v614_v54  ;;  %v566_v45 = vld [vmem:[%s4114_s25 + $0xa28] sm:$0xff]  ;;  %v303_v50 = vld [vmem:[%s4114_s25 + $0x1f0] sm:$0xff] }
  0xea   : > { %2850 = vmatprep.subr.bf16.mxu1 %v3608_v59  ;;  %v474_v59 = vld [vmem:[%s4114_s25 + $0x748] sm:$0xff]  ;;  %v427_v51 = vld [vmem:[%s4114_s25 + $0x5d0] sm:$0xff] }
  0xeb   : > { %v3543_v8 = vcombine.low %v474_v59, %v478_v60 }
  0xec   : > { %2810 = vmatpush1.bf16.msra.mxu0 %v3479_v1  ;;  %v3679_v1 = vcombine.low %v610_v52, %v614_v54  ;;  %v431_v52 = vld [vmem:[%s4114_s25 + $0x5f0] sm:$0xff] }
  0xed   : > { %2851 = vmatpush1.bf16.msra.mxu1 %v3607_v2  ;;  %2811 = vmatprep.subr.bf16.mxu0 %v3472_v3  ;;  %v3544_v2 = vcombine.high %v474_v59, %v478_v60  ;;  %v3672_v3 = vcombine.high %v602_v61, %v606_v62  ;;  %v295_v59 = vld [vmem:[%s4114_s25 + $0x1b0] sm:$0xff] }
  0xee   : > { %2852 = vmatprep.subr.bf16.mxu1 %v3600_v4  ;;  %v466_v4 = vld [vmem:[%s4114_s25 + $0x708] sm:$0xff]  ;;  %v419_v60 = vld [vmem:[%s4114_s25 + $0x590] sm:$0xff] }
  0xef   : > { %v3535_v18 = vcombine.low %v466_v4, %v470_v5 }
  0xf0   : > { %2812 = vmatpush1.bf16.msra.mxu0 %v3471_v10  ;;  %v3671_v10 = vcombine.low %v602_v61, %v606_v62  ;;  %v423_v61 = vld [vmem:[%s4114_s25 + $0x5b0] sm:$0xff] }
  0xf1   : > { %2853 = vmatpush1.bf16.msra.mxu1 %v3599_v11  ;;  %2813 = vmatprep.subr.bf16.mxu0 %v3464_v12  ;;  %v3536_v11 = vcombine.high %v466_v4, %v470_v5  ;;  %v3664_v12 = vcombine.high %v594_v6, %v598_v7  ;;  %v287_v4 = vld [vmem:[%s4114_s25 + $0x170] sm:$0xff] }
  0xf2   : > { %2854 = vmatprep.subr.bf16.mxu1 %v3592_v14  ;;  %v458_v14 = vld [vmem:[%s4114_s25 + $0x6c8] sm:$0xff]  ;;  %v411_v5 = vld [vmem:[%s4114_s25 + $0x550] sm:$0xff] }
  0xf3   : > { %v3527_v27 = vcombine.low %v458_v14, %v462_v15 }
  0xf4   : > { %2814 = vmatpush1.bf16.msra.mxu0 %v3463_v19  ;;  %v3663_v19 = vcombine.low %v594_v6, %v598_v7  ;;  %v415_v6 = vld [vmem:[%s4114_s25 + $0x570] sm:$0xff] }
  0xf5   : > { %2855 = vmatpush1.bf16.msra.mxu1 %v3591_v20  ;;  %2815 = vmatprep.subr.bf16.mxu0 %v3456_v21  ;;  %v3528_v20 = vcombine.high %v458_v14, %v462_v15  ;;  %v3656_v21 = vcombine.high %v586_v16, %v590_v17  ;;  %v279_v14 = vld [vmem:[%s4114_s25 + $0x130] sm:$0xff] }
  0xf6   : > { %2856 = vmatprep.subr.bf16.mxu1 %v3584_v23  ;;  %v450_v23 = vld [vmem:[%s4114_s25 + $0x688] sm:$0xff]  ;;  %v403_v15 = vld [vmem:[%s4114_s25 + $0x510] sm:$0xff] }
  0xf7   : > { %v3519_v37 = vcombine.low %v450_v23, %v454_v24 }
  0xf8   : > { %2816 = vmatpush1.bf16.msra.mxu0 %v3455_v29  ;;  %v3655_v29 = vcombine.low %v586_v16, %v590_v17  ;;  %v407_v16 = vld [vmem:[%s4114_s25 + $0x530] sm:$0xff] }
  0xf9   : > { %2857 = vmatpush1.bf16.msra.mxu1 %v3583_v30  ;;  %2817 = vmatprep.subr.bf16.mxu0 %v3448_v31  ;;  %v3520_v30 = vcombine.high %v450_v23, %v454_v24  ;;  %v3648_v31 = vcombine.high %v578_v25, %v582_v26  ;;  %v271_v23 = vld [vmem:[%s4114_s25 + $0xf0] sm:$0xff] }
  0xfa   : > { %2858 = vmatprep.subr.bf16.mxu1 %v3576_v33  ;;  %v442_v33 = vld [vmem:[%s4114_s25 + $0x648] sm:$0xff]  ;;  %v395_v24 = vld [vmem:[%s4114_s25 + $0x4d0] sm:$0xff] }
  0xfb   : > { %v3511_v53 = vcombine.low %v442_v33, %v446_v34 }
  0xfc   : > { %2818 = vmatpush1.bf16.msra.mxu0 %v3447_v28  ;;  %v3647_v28 = vcombine.low %v578_v25, %v582_v26  ;;  %v399_v25 = vld [vmem:[%s4114_s25 + $0x4f0] sm:$0xff] }
  0xfd   : > { %2859 = vmatpush1.bf16.msra.mxu1 %v3575_v39  ;;  %2819 = vmatprep.subr.bf16.mxu0 %v3440_v40  ;;  %v3512_v39 = vcombine.high %v442_v33, %v446_v34  ;;  %v3640_v40 = vcombine.high %v570_v35, %v574_v36  ;;  %v263_v33 = vld [vmem:[%s4114_s25 + $0xb0] sm:$0xff] }
  0xfe   : > { %2860 = vmatprep.subr.bf16.mxu1 %v3568_v41  ;;  %v434_v41 = vld [vmem:[%s4114_s25 + $0x608] sm:$0xff]  ;;  %v387_v34 = vld [vmem:[%s4114_s25 + $0x490] sm:$0xff] }
  0xff   : > { %v3503_v54 = vcombine.low %v434_v41, %v438_v42 }
 0x100   : > { %2820 = vmatpush1.bf16.msra.mxu0 %v3439_v46  ;;  %v3639_v46 = vcombine.low %v570_v35, %v574_v36  ;;  %v391_v35 = vld [vmem:[%s4114_s25 + $0x4b0] sm:$0xff] }
 0x101   : > { %2861 = vmatpush1.bf16.msra.mxu1 %v3567_v47  ;;  %2821 = vmatprep.subr.bf16.mxu0 %v3560_v48  ;;  %v3504_v47 = vcombine.high %v434_v41, %v438_v42  ;;  %v3632_v48 = vcombine.high %v562_v44, %v566_v45  ;;  %v255_v41 = vld [vmem:[%s4114_s25 + $0x70] sm:$0xff] }
 0x102   : > { %2862 = vmatprep.subr.bf16.mxu1 %v3688_v49  ;;  %v299_v49 = vld [vmem:[%s4114_s25 + $0x1d0] sm:$0xff] }
 0x103   : > { %v3369_v62 = vcombine.low %v299_v49, %v303_v50  ;;  %v379_v42 = vld [vmem:[%s4114_s25 + $0x450] sm:$0xff] }
 0x104   : > { %2822 = vmatpush2.bf16.msra.mxu0 %v3559_v55  ;;  %v3631_v55 = vcombine.low %v562_v44, %v566_v45  ;;  %v383_v44 = vld [vmem:[%s4114_s25 + $0x470] sm:$0xff] }
 0x105   : > { %2863 = vmatpush2.bf16.msra.mxu1 %v3687_v56  ;;  %2823 = vmatprep.subr.bf16.mxu0 %v3552_v57  ;;  %v3370_v56 = vcombine.high %v299_v49, %v303_v50  ;;  %v3498_v57 = vcombine.high %v427_v51, %v431_v52  ;;  %v247_v49 = vld [vmem:[%s4114_s25 + $0x30] sm:$0xff] }
 0x106   : > { %2864 = vmatprep.subr.bf16.mxu1 %v3680_v58  ;;  %v291_v58 = vld [vmem:[%s4114_s25 + $0x190] sm:$0xff] }
 0x107   : > { %v3361_v7 = vcombine.low %v291_v58, %v295_v59  ;;  %v371_v50 = vld [vmem:[%s4114_s25 + $0x410] sm:$0xff] }
 0x108   : > { %2824 = vmatpush2.bf16.msra.mxu0 %v3551_v0  ;;  %v3497_v0 = vcombine.low %v427_v51, %v431_v52  ;;  %v375_v51 = vld [vmem:[%s4114_s25 + $0x430] sm:$0xff] }
 0x109   : > { %2865 = vmatpush2.bf16.msra.mxu1 %v3679_v1  ;;  %2825 = vmatprep.subr.bf16.mxu0 %v3544_v2  ;;  %v3362_v1 = vcombine.high %v291_v58, %v295_v59  ;;  %v3490_v2 = vcombine.high %v419_v60, %v423_v61  ;;  %v367_v58 = vld [vmem:[%s4114_s25 + $0x3f0] sm:$0xff] }
 0x10a   : > { %2866 = vmatprep.subr.bf16.mxu1 %v3672_v3  ;;  %v283_v3 = vld [vmem:[%s4114_s25 + $0x150] sm:$0xff] }
 0x10b   : > { %v3353_v17 = vcombine.low %v283_v3, %v287_v4  ;;  %v491_v59 = vld [vmem:[%s4114_s25 + $0x7d0] sm:$0xff] }
 0x10c   : > { %2826 = vmatpush2.bf16.msra.mxu0 %v3543_v8  ;;  %v3489_v8 = vcombine.low %v419_v60, %v423_v61  ;;  %v495_v60 = vld [vmem:[%s4114_s25 + $0x7f0] sm:$0xff] }
 0x10d   : > { %2867 = vmatpush2.bf16.msra.mxu1 %v3671_v10  ;;  %2827 = vmatprep.subr.bf16.mxu0 %v3536_v11  ;;  %v3354_v10 = vcombine.high %v283_v3, %v287_v4  ;;  %v3482_v11 = vcombine.high %v411_v5, %v415_v6  ;;  %v359_v3 = vld [vmem:[%s4114_s25 + $0x3b0] sm:$0xff] }
 0x10e   : > { %2868 = vmatprep.subr.bf16.mxu1 %v3664_v12  ;;  %v275_v12 = vld [vmem:[%s4114_s25 + $0x110] sm:$0xff] }
 0x10f   : > { %v3345_v26 = vcombine.low %v275_v12, %v279_v14  ;;  %v483_v4 = vld [vmem:[%s4114_s25 + $0x790] sm:$0xff] }
 0x110   : > { %2828 = vmatpush2.bf16.msra.mxu0 %v3535_v18  ;;  %v3481_v18 = vcombine.low %v411_v5, %v415_v6  ;;  %v487_v5 = vld [vmem:[%s4114_s25 + $0x7b0] sm:$0xff] }
 0x111   : > { %2869 = vmatpush2.bf16.msra.mxu1 %v3663_v19  ;;  %2829 = vmatprep.subr.bf16.mxu0 %v3528_v20  ;;  %v3346_v19 = vcombine.high %v275_v12, %v279_v14  ;;  %v3474_v20 = vcombine.high %v403_v15, %v407_v16  ;;  %v351_v12 = vld [vmem:[%s4114_s25 + $0x370] sm:$0xff] }
 0x112   : > { %2870 = vmatprep.subr.bf16.mxu1 %v3656_v21  ;;  %v267_v21 = vld [vmem:[%s4114_s25 + $0xd0] sm:$0xff] }
 0x113   : > { %v3337_v36 = vcombine.low %v267_v21, %v271_v23  ;;  %v475_v14 = vld [vmem:[%s4114_s25 + $0x750] sm:$0xff] }
 0x114   : > { %2830 = vmatpush2.bf16.msra.mxu0 %v3527_v27  ;;  %v3473_v27 = vcombine.low %v403_v15, %v407_v16  ;;  %v479_v15 = vld [vmem:[%s4114_s25 + $0x770] sm:$0xff] }
 0x115   : > { %2871 = vmatpush2.bf16.msra.mxu1 %v3655_v29  ;;  %2831 = vmatprep.subr.bf16.mxu0 %v3520_v30  ;;  %v3338_v29 = vcombine.high %v267_v21, %v271_v23  ;;  %v3466_v30 = vcombine.high %v395_v24, %v399_v25  ;;  %v343_v21 = vld [vmem:[%s4114_s25 + $0x330] sm:$0xff] }
 0x116   : > { %2872 = vmatprep.subr.bf16.mxu1 %v3648_v31  ;;  %v259_v31 = vld [vmem:[%s4114_s25 + $0x90] sm:$0xff] }
 0x117   : > { %v3329_v45 = vcombine.low %v259_v31, %v263_v33  ;;  %v467_v23 = vld [vmem:[%s4114_s25 + $0x710] sm:$0xff] }
 0x118   : > { %2832 = vmatpush2.bf16.msra.mxu0 %v3519_v37  ;;  %v3465_v37 = vcombine.low %v395_v24, %v399_v25  ;;  %v471_v24 = vld [vmem:[%s4114_s25 + $0x730] sm:$0xff] }
 0x119   : > { %2873 = vmatpush2.bf16.msra.mxu1 %v3647_v28  ;;  %2833 = vmatprep.subr.bf16.mxu0 %v3512_v39  ;;  %v3330_v28 = vcombine.high %v259_v31, %v263_v33  ;;  %v3458_v39 = vcombine.high %v387_v34, %v391_v35  ;;  %v335_v31 = vld [vmem:[%s4114_s25 + $0x2f0] sm:$0xff] }
 0x11a   : > { %2874 = vmatprep.subr.bf16.mxu1 %v3640_v40  ;;  %v251_v40 = vld [vmem:[%s4114_s25 + $0x50] sm:$0xff] }
 0x11b   : > { %v3321_v52 = vcombine.low %v251_v40, %v255_v41  ;;  %v459_v33 = vld [vmem:[%s4114_s25 + $0x6d0] sm:$0xff] }
 0x11c   : > { %2834 = vmatpush2.bf16.msra.mxu0 %v3511_v53  ;;  %v3457_v53 = vcombine.low %v387_v34, %v391_v35  ;;  %v463_v34 = vld [vmem:[%s4114_s25 + $0x6f0] sm:$0xff] }
 0x11d   : > { %2875 = vmatpush2.bf16.msra.mxu1 %v3639_v46  ;;  %2835 = vmatprep.subr.bf16.mxu0 %v3504_v47  ;;  %v3322_v46 = vcombine.high %v251_v40, %v255_v41  ;;  %v3450_v47 = vcombine.high %v379_v42, %v383_v44  ;;  %v327_v40 = vld [vmem:[%s4114_s25 + $0x2b0] sm:$0xff] }
 0x11e   : > { %2876 = vmatprep.subr.bf16.mxu1 %v3632_v48  ;;  %v243_v48 = vld [vmem:[%s4114_s25 + $0x10] sm:$0xff] }
 0x11f   : > { %v3313_v61 = vcombine.low %v243_v48, %v247_v49  ;;  %v451_v41 = vld [vmem:[%s4114_s25 + $0x690] sm:$0xff] }
 0x120   : > { %2836 = vmatpush2.bf16.msra.mxu0 %v3503_v54  ;;  %v3449_v54 = vcombine.low %v379_v42, %v383_v44  ;;  %v455_v42 = vld [vmem:[%s4114_s25 + $0x6b0] sm:$0xff] }
 0x121   : > { %2877 = vmatpush2.bf16.msra.mxu1 %v3631_v55  ;;  %2887 = vmatprep.subr.bf16.mxu0 %v3370_v56  ;;  %v3314_v55 = vcombine.high %v243_v48, %v247_v49  ;;  %v3442_v56 = vcombine.high %v371_v50, %v375_v51  ;;  %v319_v48 = vld [vmem:[%s4114_s25 + $0x270] sm:$0xff] }
 0x122   : > { %2928 = vmatprep.subr.bf16.mxu1 %v3498_v57  ;;  %v363_v57 = vld [vmem:[%s4114_s25 + $0x3d0] sm:$0xff] }
 0x123   : > { %2838 = vmatmul.mubr.bf16.vlgmr.msra.gmra.mxu0 %v4226_v63  ;;  %v3433_v6 = vcombine.low %v363_v57, %v367_v58  ;;  %v443_v49 = vld [vmem:[%s4114_s25 + $0x650] sm:$0xff] }
 0x124   : > { %2879 = vmatmul.mubr.bf16.vlgmr.msra.gmra.mxu1 %v4188_v32  ;;  %2888 = vmatpush1.bf16.msra.mxu0 %v3369_v62  ;;  %v3441_v62 = vcombine.low %v371_v50, %v375_v51  ;;  %v447_v50 = vld [vmem:[%s4114_s25 + $0x670] sm:$0xff] }
 0x125   : > { %2929 = vmatpush1.bf16.msra.mxu1 %v3497_v0  ;;  %2889 = vmatprep.subr.bf16.mxu0 %v3362_v1  ;;  %v3434_v0 = vcombine.high %v363_v57, %v367_v58  ;;  %v3562_v1 = vcombine.high %v491_v59, %v495_v60  ;;  %v311_v57 = vld [vmem:[%s4114_s25 + $0x230] sm:$0xff] }
 0x126   : > { %2930 = vmatprep.subr.bf16.mxu1 %v3490_v2  ;;  %2919 = vmatprep.mubr.bf16.mxu0 %v4165_v9  ;;  %v355_v2 = vld [vmem:[%s4114_s25 + $0x390] sm:$0xff] }
 0x127   : > { %2960 = vmatprep.mubr.bf16.mxu1 %v4172_v13  ;;  %v3425_v16 = vcombine.low %v355_v2, %v359_v3  ;;  %v435_v58 = vld [vmem:[%s4114_s25 + $0x610] sm:$0xff] }
 0x128   : > { %2890 = vmatpush1.bf16.msra.mxu0 %v3361_v7  ;;  %v3561_v7 = vcombine.low %v491_v59, %v495_v60  ;;  %v439_v59 = vld [vmem:[%s4114_s25 + $0x630] sm:$0xff] }
 0x129   : > { %2931 = vmatpush1.bf16.msra.mxu1 %v3489_v8  ;;  %2891 = vmatprep.subr.bf16.mxu0 %v3354_v10  ;;  %v3426_v8 = vcombine.high %v355_v2, %v359_v3  ;;  %v3554_v10 = vcombine.high %v483_v4, %v487_v5  ;;  %v559_v2 = vld [vmem:[%s4114_s25 + $0x9f0] sm:$0xff]  ;;  %v300_v3 = vld [vmem:[%s4114_s25 + $0x1d8] sm:$0xff] }
 0x12a   : > { %2932 = vmatprep.subr.bf16.mxu1 %v3482_v11  ;;  %v347_v11 = vld [vmem:[%s4114_s25 + $0x350] sm:$0xff] }
 0x12b   : > { %v3417_v25 = vcombine.low %v347_v11, %v351_v12 }
 0x12c   : > { %2892 = vmatpush1.bf16.msra.mxu0 %v3353_v17  ;;  %v3553_v17 = vcombine.low %v483_v4, %v487_v5  ;;  %v304_v4 = vld [vmem:[%s4114_s25 + $0x1f8] sm:$0xff] }
 0x12d   : > { %2933 = vmatpush1.bf16.msra.mxu1 %v3481_v18  ;;  %2893 = vmatprep.subr.bf16.mxu0 %v3346_v19  ;;  %v3418_v18 = vcombine.high %v347_v11, %v351_v12  ;;  %v3546_v19 = vcombine.high %v475_v14, %v479_v15  ;;  %v3372_v11 = vcombine.high %v300_v3, %v304_v4  ;;  %v633_v12 = vsub.s32 1, %v4142_v43 }
 0x12e   : > { %2934 = vmatprep.subr.bf16.mxu1 %v3474_v20  ;;  %v339_v20 = vld [vmem:[%s4114_s25 + $0x310] sm:$0xff] }
 0x12f   : > { %v3409_v35 = vcombine.low %v339_v20, %v343_v21 }
 0x130   : > { %2894 = vmatpush1.bf16.msra.mxu0 %v3345_v26  ;;  %v3545_v26 = vcombine.low %v475_v14, %v479_v15  ;;  %v547_v14 = vld [vmem:[%s4114_s25 + $0x990] sm:$0xff] }
 0x131   : > { %2935 = vmatpush1.bf16.msra.mxu1 %v3473_v27  ;;  %2895 = vmatprep.subr.bf16.mxu0 %v3338_v29  ;;  %v3410_v27 = vcombine.high %v339_v20, %v343_v21  ;;  %v3538_v29 = vcombine.high %v467_v23, %v471_v24  ;;  %v551_v15 = vld [vmem:[%s4114_s25 + $0x9b0] sm:$0xff]  ;;  %v3371_v20 = vcombine.low %v300_v3, %v304_v4  ;;  %v264_v3 = vld [vmem:[%s4114_s25 + $0xb8] sm:$0xff] }
 0x132   : > { %2936 = vmatprep.subr.bf16.mxu1 %v3466_v30  ;;  %v331_v30 = vld [vmem:[%s4114_s25 + $0x2d0] sm:$0xff]  ;;  %v3618_v21 = vcombine.high %v547_v14, %v551_v15 }
 0x133   : > { %v3401_v44 = vcombine.low %v331_v30, %v335_v31 }
 0x134   : > { %2896 = vmatpush1.bf16.msra.mxu0 %v3337_v36  ;;  %v3537_v36 = vcombine.low %v467_v23, %v471_v24 }
 0x135   : > { %2937 = vmatpush1.bf16.msra.mxu1 %v3465_v37  ;;  %2897 = vmatprep.subr.bf16.mxu0 %v3330_v28  ;;  %v3402_v37 = vcombine.high %v331_v30, %v335_v31  ;;  %v3530_v28 = vcombine.high %v459_v33, %v463_v34  ;;  %v288_v30 = vld [vmem:[%s4114_s25 + $0x178] sm:$0xff] }
 0x136   : > { %2938 = vmatprep.subr.bf16.mxu1 %v3458_v39  ;;  %v323_v39 = vld [vmem:[%s4114_s25 + $0x290] sm:$0xff] }
 0x137   : > { %v3393_v51 = vcombine.low %v323_v39, %v327_v40 }
 0x138   : > { %2898 = vmatpush1.bf16.msra.mxu0 %v3329_v45  ;;  %v3529_v45 = vcombine.low %v459_v33, %v463_v34  ;;  %v3617_v34 = vcombine.low %v547_v14, %v551_v15  ;;  %v256_v14 = vld [vmem:[%s4114_s25 + $0x78] sm:$0xff] }
 0x139   : > { %2939 = vmatpush1.bf16.msra.mxu1 %v3457_v53  ;;  %2899 = vmatprep.subr.bf16.mxu0 %v3322_v46  ;;  %v3394_v53 = vcombine.high %v323_v39, %v327_v40  ;;  %v3522_v46 = vcombine.high %v451_v41, %v455_v42 }
 0x13a   : > { %2940 = vmatprep.subr.bf16.mxu1 %v3450_v47  ;;  %v315_v47 = vld [vmem:[%s4114_s25 + $0x250] sm:$0xff] }
 0x13b   : > { %v3385_v60 = vcombine.low %v315_v47, %v319_v48 }
 0x13c   : > { %2900 = vmatpush1.bf16.msra.mxu0 %v3321_v52  ;;  %v3521_v52 = vcombine.low %v451_v41, %v455_v42  ;;  %v531_v42 = vld [vmem:[%s4114_s25 + $0x910] sm:$0xff] }
 0x13d   : > { %2941 = vmatpush1.bf16.msra.mxu1 %v3449_v54  ;;  %2901 = vmatprep.subr.bf16.mxu0 %v3314_v55  ;;  %v3386_v54 = vcombine.high %v315_v47, %v319_v48  ;;  %v3514_v55 = vcombine.high %v443_v49, %v447_v50 }
 0x13e   : > { %2942 = vmatprep.subr.bf16.mxu1 %v3442_v56  ;;  %v307_v56 = vld [vmem:[%s4114_s25 + $0x210] sm:$0xff] }
 0x13f   : > { %v3377_v5 = vcombine.low %v307_v56, %v311_v57 }
 0x140   : > { %2902 = vmatpush1.bf16.msra.mxu0 %v3313_v61  ;;  %v3513_v61 = vcombine.low %v443_v49, %v447_v50 }
 0x141   : > { %2943 = vmatpush1.bf16.msra.mxu1 %v3441_v62  ;;  %2903 = vmatprep.subr.bf16.mxu0 %v3434_v0  ;;  %v3378_v62 = vcombine.high %v307_v56, %v311_v57  ;;  %v3506_v0 = vcombine.high %v435_v58, %v439_v59  ;;  %v523_v56 = vld [vmem:[%s4114_s25 + $0x8d0] sm:$0xff]  ;;  %v268_v57 = vld [vmem:[%s4114_s25 + $0xd8] sm:$0xff] }
 0x142   : > { %2944 = vmatprep.subr.bf16.mxu1 %v3562_v1  ;;  %v555_v1 = vld [vmem:[%s4114_s25 + $0x9d0] sm:$0xff] }
 0x144   : > { %2904 = vmatpush2.bf16.msra.mxu0 %v3433_v6  ;;  %v629_v6 = vsub.s32 0, %v4142_v43 }
 0x145   : > { %2945 = vmatpush2.bf16.msra.mxu1 %v3561_v7  ;;  %2905 = vmatprep.subr.bf16.mxu0 %v3426_v8  ;;  %v3505_v7 = vcombine.low %v435_v58, %v439_v59  ;;  %v4433_v8 = vld [vmem:[%s209_s28] sm:$0xff]  ;;  %v272_v58 = vld [vmem:[%s4114_s25 + $0xf8] sm:$0xff] }
 0x146   : > { %2946 = vmatprep.subr.bf16.mxu1 %v3554_v10  ;;  %v3626_v10 = vcombine.high %v555_v1, %v559_v2  ;;  %v634_v23 = vrot.slane %v4433_v8, %v633_v12  ;;  %v252_v12 = vld [vmem:[%s4114_s25 + $0x58] sm:$0xff] }
 0x148   : > { %2906 = vmatpush2.bf16.msra.mxu0 %v3425_v16  ;;  %v292_v16 = vld [vmem:[%s4114_s25 + $0x198] sm:$0xff] }
 0x149   : > { %2947 = vmatpush2.bf16.msra.mxu1 %v3553_v17  ;;  %2907 = vmatprep.subr.bf16.mxu0 %v3418_v18  ;;  %v296_v17 = vld [vmem:[%s4114_s25 + $0x1b8] sm:$0xff]  ;;  %v630_v18 = vrot.slane %v4433_v8, %v629_v6 }
 0x14a   : > { %2948 = vmatprep.subr.bf16.mxu1 %v3546_v19  ;;  %v3625_v19 = vcombine.low %v555_v1, %v559_v2  ;;  %v3364_v24 = vcombine.high %v292_v16, %v296_v17  ;;  %v519_v1 = vld [vmem:[%s4114_s25 + $0x8b0] sm:$0xff]  ;;  %v260_v2 = vld [vmem:[%s4114_s25 + $0x98] sm:$0xff] }
 0x14c   : > { %2908 = vmatpush2.bf16.msra.mxu0 %v3417_v25  ;;  %v539_v25 = vld [vmem:[%s4114_s25 + $0x950] sm:$0xff] }
 0x14d   : > { %2949 = vmatpush2.bf16.msra.mxu1 %v3545_v26  ;;  %2909 = vmatprep.subr.bf16.mxu0 %v3410_v27  ;;  %v543_v26 = vld [vmem:[%s4114_s25 + $0x970] sm:$0xff] }
 0x14e   : > { %2950 = vmatprep.subr.bf16.mxu1 %v3538_v29  ;;  %v284_v29 = vld [vmem:[%s4114_s25 + $0x158] sm:$0xff]  ;;  %v3609_v49 = vcombine.low %v539_v25, %v543_v26 }
 0x14f   : > { %v3356_v41 = vcombine.high %v284_v29, %v288_v30 }
 0x150   : > { %2910 = vmatpush2.bf16.msra.mxu0 %v3409_v35 }
 0x151   : > { %2951 = vmatpush2.bf16.msra.mxu1 %v3537_v36  ;;  %2911 = vmatprep.subr.bf16.mxu0 %v3402_v37  ;;  %v3363_v36 = vcombine.low %v292_v16, %v296_v17  ;;  %v3610_v37 = vcombine.high %v539_v25, %v543_v26  ;;  %v3331_v16 = vcombine.low %v260_v2, %v264_v3 }
 0x152   : > { %2952 = vmatprep.subr.bf16.mxu1 %v3530_v28  ;;  %v3323_v25 = vcombine.low %v252_v12, %v256_v14 }
 0x154   : > { %2912 = vmatpush2.bf16.msra.mxu0 %v3401_v44  ;;  %v535_v44 = vld [vmem:[%s4114_s25 + $0x930] sm:$0xff] }
 0x155   : > { %2953 = vmatpush2.bf16.msra.mxu1 %v3529_v45  ;;  %2913 = vmatprep.subr.bf16.mxu0 %v3394_v53  ;;  %v276_v53 = vld [vmem:[%s4114_s25 + $0x118] sm:$0xff]  ;;  %v3601_v59 = vcombine.low %v531_v42, %v535_v44 }
 0x156   : > { %2954 = vmatprep.subr.bf16.mxu1 %v3522_v46  ;;  %v280_v46 = vld [vmem:[%s4114_s25 + $0x138] sm:$0xff] }
 0x158   : > { %2914 = vmatpush2.bf16.msra.mxu0 %v3393_v51  ;;  %v3355_v51 = vcombine.low %v284_v29, %v288_v30  ;;  %v619_v29 = vld [vmem:[%s4114_s25 + $0xbd0] sm:$0xff] }
 0x159   : > { %2955 = vmatpush2.bf16.msra.mxu1 %v3521_v52  ;;  %2915 = vmatprep.subr.bf16.mxu0 %v3386_v54  ;;  %v3602_v52 = vcombine.high %v531_v42, %v535_v44  ;;  %v623_v30 = vld [vmem:[%s4114_s25 + $0xbf0] sm:$0xff]  ;;  %v360_v42 = vld [vmem:[%s4114_s25 + $0x3b8] sm:$0xff] }
 0x15a   : > { %2956 = vmatprep.subr.bf16.mxu1 %v3514_v55  ;;  %v3348_v55 = vcombine.high %v276_v53, %v280_v46  ;;  %v3689_v44 = vcombine.low %v619_v29, %v623_v30 }
 0x15c   : > { %2916 = vmatpush2.bf16.msra.mxu0 %v3385_v60  ;;  %v3347_v60 = vcombine.low %v276_v53, %v280_v46 }
 0x15d   : > { %2957 = vmatpush2.bf16.msra.mxu1 %v3513_v61  ;;  %2917 = vmatprep.subr.bf16.mxu0 %v3378_v62  ;;  %v3340_v62 = vcombine.high %v268_v57, %v272_v58 }
 0x15e   : > { %2958 = vmatprep.subr.bf16.mxu1 %v3506_v0  ;;  %v515_v0 = vld [vmem:[%s4114_s25 + $0x890] sm:$0xff] }
 0x15f   : > { %v3586_v6 = vcombine.high %v515_v0, %v519_v1  ;;  %v3585_v15 = vcombine.low %v515_v0, %v519_v1  ;;  %v587_v1 = vld [vmem:[%s4114_s25 + $0xad0] sm:$0xff] }
 0x160   : > { %2918 = vmatpush2.bf16.msra.mxu0 %v3377_v5  ;;  %v3339_v5 = vcombine.low %v268_v57, %v272_v58  ;;  %v599_v57 = vld [vmem:[%s4114_s25 + $0xb30] sm:$0xff]  ;;  %v340_v58 = vld [vmem:[%s4114_s25 + $0x318] sm:$0xff] }
 0x161   : > { %2959 = vmatpush2.bf16.msra.mxu1 %v3505_v7  ;;  %2969 = vmatprep.subr.bf16.mxu0 %v3626_v10  ;;  %v3332_v7 = vcombine.high %v260_v2, %v264_v3  ;;  %v507_v10 = vld [vmem:[%s4114_s25 + $0x850] sm:$0xff]  ;;  %v332_v3 = vld [vmem:[%s4114_s25 + $0x2d8] sm:$0xff] }
 0x162   : > { %3010 = vmatprep.subr.bf16.mxu1 %v3372_v11  ;;  %v511_v11 = vld [vmem:[%s4114_s25 + $0x870] sm:$0xff] }
 0x163   : > { %v2675_v27 = vpop.f32.mrf.mxu0  ;;  %2920 = vmatmul.mubr.bf16.vlgmr.msra.gmra.mxu0 %v4216_v22  ;;  %v3578_v17 = vcombine.high %v507_v10, %v511_v11  ;;  %v591_v2 = vld [vmem:[%s4114_s25 + $0xaf0] sm:$0xff] }
 0x164   : > { %v2676_v31 = vadd.f32 %v2675_v27, %v630_v18  ;;  %v2716_v33 = vpop.f32.mrf.mxu1  ;;  %2961 = vmatmul.mubr.bf16.vlgmr.msra.gmra.mxu1 %v4226_v63  ;;  %2970 = vmatpush1.bf16.msra.mxu0 %v3625_v19  ;;  %v3324_v18 = vcombine.high %v252_v12, %v256_v14  ;;  %v499_v19 = vld [vmem:[%s4114_s25 + $0x810] sm:$0xff]  ;;  %v324_v14 = vld [vmem:[%s4114_s25 + $0x298] sm:$0xff] }
 0x165   : > { %3011 = vmatpush1.bf16.msra.mxu1 %v3371_v20  ;;  %v2677_v35 = vpop.f32.mrf.mxu0  ;;  %2971 = vmatprep.subr.bf16.mxu0 %v3618_v21  ;;  %v503_v20 = vld [vmem:[%s4114_s25 + $0x830] sm:$0xff]  ;;  %v244_v21 = vld [vmem:[%s4114_s25 + $0x18] sm:$0xff] }
 0x166   : > { %v4448_v28 = vadd.f32 %v2716_v33, %v2676_v31  ;;  %v2678_v39 = vadd.f32 %v2677_v35, %v634_v23  ;;  %v2718_v40 = vpop.f32.mrf.mxu1  ;;  %3012 = vmatprep.subr.bf16.mxu1 %v3364_v24  ;;  %3001 = vmatprep.mubr.bf16.mxu0 %v4231_v38  ;;  %v248_v23 = vld [vmem:[%s4114_s25 + $0x38] sm:$0xff]  ;;  %v3577_v24 = vcombine.low %v507_v10, %v511_v11  ;;  %v579_v11 = vld [vmem:[%s4114_s25 + $0xa90] sm:$0xff] }
 0x167   : > { %v2679_v45 = vpop.f32.mrf.mxu0  ;;  %3042 = vmatprep.mubr.bf16.mxu1 %v4165_v9  ;;  %v527_v9 = vld [vmem:[%s4114_s25 + $0x8f0] sm:$0xff]  ;;  %v3570_v26 = vcombine.high %v499_v19, %v503_v20  ;;  %v3316_v27 = vcombine.high %v244_v21, %v248_v23  ;;  %v364_v31 = vld [vmem:[%s4114_s25 + $0x3d8] sm:$0xff]  ;;  %v3315_v35 = vcombine.low %v244_v21, %v248_v23 }
 0x168   : > { %v4456_v47 = vadd.f32 %v2718_v40, %v2678_v39  ;;  %v2720_v48 = vpop.f32.mrf.mxu1  ;;  %2972 = vmatpush1.bf16.msra.mxu0 %v3617_v34  ;;  %v3594_v61 = vcombine.high %v523_v56, %v527_v9  ;;  %v3593_v4 = vcombine.low %v523_v56, %v527_v9  ;;  %v368_v33 = vld [vmem:[%s4114_s25 + $0x3f8] sm:$0xff]  ;;  %v3569_v34 = vcombine.low %v499_v19, %v503_v20  ;;  %v611_v39 = vld [vmem:[%s4114_s25 + $0xb90] sm:$0xff] }
 0x169   : > { %3013 = vmatpush1.bf16.msra.mxu1 %v3363_v36  ;;  %v2680_v50 = vpop.f32.mrf.mxu0  ;;  %2973 = vmatprep.subr.bf16.mxu0 %v3610_v37  ;;  %v3690_v36 = vcombine.high %v619_v29, %v623_v30  ;;  %v3436_v37 = vcombine.high %v364_v31, %v368_v33  ;;  %v615_v40 = vld [vmem:[%s4114_s25 + $0xbb0] sm:$0xff]  ;;  %v3435_v45 = vcombine.low %v364_v31, %v368_v33  ;;  %v316_v23 = vld [vmem:[%s4114_s25 + $0x258] sm:$0xff] }
 0x16a   : > { %v2721_v54 = vpop.f32.mrf.mxu1  ;;  %3014 = vmatprep.subr.bf16.mxu1 %v3356_v41  ;;  %v356_v41 = vld [vmem:[%s4114_s25 + $0x398] sm:$0xff]  ;;  %v3682_v53 = vcombine.high %v611_v39, %v615_v40  ;;  %v603_v48 = vld [vmem:[%s4114_s25 + $0xb50] sm:$0xff] }
 0x16b   : > { %v3428_v46 = vcombine.high %v356_v41, %v360_v42  ;;  %v348_v50 = vld [vmem:[%s4114_s25 + $0x358] sm:$0xff]  ;;  %v3427_v54 = vcombine.low %v356_v41, %v360_v42  ;;  %v595_v9 = vld [vmem:[%s4114_s25 + $0xb10] sm:$0xff] }
 0x16c   : > { %2974 = vmatpush1.bf16.msra.mxu0 %v3609_v49  ;;  %v607_v49 = vld [vmem:[%s4114_s25 + $0xb70] sm:$0xff]  ;;  %v308_v33 = vld [vmem:[%s4114_s25 + $0x218] sm:$0xff] }
 0x16d   : > { %3015 = vmatpush1.bf16.msra.mxu1 %v3355_v51  ;;  %2975 = vmatprep.subr.bf16.mxu0 %v3602_v52  ;;  %v352_v51 = vld [vmem:[%s4114_s25 + $0x378] sm:$0xff]  ;;  %v3681_v52 = vcombine.low %v611_v39, %v615_v40  ;;  %v583_v12 = vld [vmem:[%s4114_s25 + $0xab0] sm:$0xff] }
 0x16e   : > { %3016 = vmatprep.subr.bf16.mxu1 %v3348_v55  ;;  %v3674_v55 = vcombine.high %v603_v48, %v607_v49  ;;  %v3420_v56 = vcombine.high %v348_v50, %v352_v51  ;;  %v571_v20 = vld [vmem:[%s4114_s25 + $0xa50] sm:$0xff]  ;;  %v428_v40 = vld [vmem:[%s4114_s25 + $0x5d8] sm:$0xff] }
 0x16f   : > { %v575_v21 = vld [vmem:[%s4114_s25 + $0xa70] sm:$0xff]  ;;  %v432_v41 = vld [vmem:[%s4114_s25 + $0x5f8] sm:$0xff] }
 0x170   : > { %2976 = vmatpush1.bf16.msra.mxu0 %v3601_v59  ;;  %v344_v59 = vld [vmem:[%s4114_s25 + $0x338] sm:$0xff]  ;;  %v563_v30 = vld [vmem:[%s4114_s25 + $0xa10] sm:$0xff] }
 0x171   : > { %3017 = vmatpush1.bf16.msra.mxu1 %v3347_v60  ;;  %2977 = vmatprep.subr.bf16.mxu0 %v3594_v61  ;;  %v3673_v60 = vcombine.low %v603_v48, %v607_v49  ;;  %v3419_v61 = vcombine.low %v348_v50, %v352_v51  ;;  %v3412_v0 = vcombine.high %v340_v58, %v344_v59  ;;  %v567_v31 = vld [vmem:[%s4114_s25 + $0xa30] sm:$0xff]  ;;  %v556_v42 = vld [vmem:[%s4114_s25 + $0x9d8] sm:$0xff] }
 0x172   : > { %3018 = vmatprep.subr.bf16.mxu1 %v3340_v62  ;;  %v3666_v62 = vcombine.high %v595_v9, %v599_v57  ;;  %v420_v49 = vld [vmem:[%s4114_s25 + $0x598] sm:$0xff] }
 0x173   : > { %v424_v50 = vld [vmem:[%s4114_s25 + $0x5b8] sm:$0xff] }
 0x174   : > { %2978 = vmatpush1.bf16.msra.mxu0 %v3593_v4  ;;  %v336_v4 = vld [vmem:[%s4114_s25 + $0x2f8] sm:$0xff] }
 0x175   : > { %3019 = vmatpush1.bf16.msra.mxu1 %v3339_v5  ;;  %2979 = vmatprep.subr.bf16.mxu0 %v3586_v6  ;;  %v3665_v5 = vcombine.low %v595_v9, %v599_v57  ;;  %v3411_v6 = vcombine.low %v340_v58, %v344_v59  ;;  %v3404_v10 = vcombine.high %v332_v3, %v336_v4  ;;  %v548_v51 = vld [vmem:[%s4114_s25 + $0x998] sm:$0xff] }
 0x176   : > { %3020 = vmatprep.subr.bf16.mxu1 %v3332_v7  ;;  %v3658_v7 = vcombine.high %v587_v1, %v591_v2  ;;  %v412_v57 = vld [vmem:[%s4114_s25 + $0x558] sm:$0xff] }
 0x177   : > { %v416_v58 = vld [vmem:[%s4114_s25 + $0x578] sm:$0xff] }
 0x178   : > { %2980 = vmatpush1.bf16.msra.mxu0 %v3585_v15  ;;  %v328_v15 = vld [vmem:[%s4114_s25 + $0x2b8] sm:$0xff] }
 0x179   : > { %3021 = vmatpush1.bf16.msra.mxu1 %v3331_v16  ;;  %2981 = vmatprep.subr.bf16.mxu0 %v3578_v17  ;;  %v3657_v16 = vcombine.low %v587_v1, %v591_v2  ;;  %v3403_v17 = vcombine.low %v332_v3, %v336_v4  ;;  %v3396_v19 = vcombine.high %v324_v14, %v328_v15 }
 0x17a   : > { %3022 = vmatprep.subr.bf16.mxu1 %v3324_v18  ;;  %v3650_v18 = vcombine.high %v579_v11, %v583_v12  ;;  %v3491_v1 = vcombine.low %v420_v49, %v424_v50  ;;  %v3484_v4 = vcombine.high %v412_v57, %v416_v58 }
 0x17c   : > { %2982 = vmatpush1.bf16.msra.mxu0 %v3577_v24  ;;  %v320_v24 = vld [vmem:[%s4114_s25 + $0x278] sm:$0xff] }
 0x17d   : > { %3023 = vmatpush1.bf16.msra.mxu1 %v3323_v25  ;;  %2983 = vmatprep.subr.bf16.mxu0 %v3570_v26  ;;  %v3649_v25 = vcombine.low %v579_v11, %v583_v12  ;;  %v3395_v26 = vcombine.low %v324_v14, %v328_v15  ;;  %v3388_v29 = vcombine.high %v316_v23, %v320_v24  ;;  %v532_v11 = vld [vmem:[%s4114_s25 + $0x918] sm:$0xff] }
 0x17e   : > { %3024 = vmatprep.subr.bf16.mxu1 %v3316_v27  ;;  %v3642_v27 = vcombine.high %v571_v20, %v575_v21  ;;  %v536_v12 = vld [vmem:[%s4114_s25 + $0x938] sm:$0xff]  ;;  %v3483_v15 = vcombine.low %v412_v57, %v416_v58 }
 0x17f   : > { %v496_v57 = vld [vmem:[%s4114_s25 + $0x7f8] sm:$0xff] }
 0x180   : > { %2984 = vmatpush1.bf16.msra.mxu0 %v3569_v34  ;;  %v312_v34 = vld [vmem:[%s4114_s25 + $0x238] sm:$0xff] }
 0x181   : > { %3025 = vmatpush1.bf16.msra.mxu1 %v3315_v35  ;;  %2985 = vmatprep.subr.bf16.mxu0 %v3690_v36  ;;  %v3641_v35 = vcombine.low %v571_v20, %v575_v21  ;;  %v3387_v36 = vcombine.low %v316_v23, %v320_v24  ;;  %v3380_v39 = vcombine.high %v308_v33, %v312_v34  ;;  %v400_v20 = vld [vmem:[%s4114_s25 + $0x4f8] sm:$0xff] }
 0x182   : > { %3026 = vmatprep.subr.bf16.mxu1 %v3436_v37  ;;  %v3634_v37 = vcombine.high %v563_v30, %v567_v31  ;;  %v524_v21 = vld [vmem:[%s4114_s25 + $0x8d8] sm:$0xff] }
 0x183   : > { %v528_v23 = vld [vmem:[%s4114_s25 + $0x8f8] sm:$0xff] }
 0x184   : > { %2986 = vmatpush2.bf16.msra.mxu0 %v3689_v44  ;;  %v560_v44 = vld [vmem:[%s4114_s25 + $0x9f8] sm:$0xff] }
 0x185   : > { %3027 = vmatpush2.bf16.msra.mxu1 %v3435_v45  ;;  %2987 = vmatprep.subr.bf16.mxu0 %v3682_v53  ;;  %v3633_v45 = vcombine.low %v563_v30, %v567_v31  ;;  %v3379_v53 = vcombine.low %v308_v33, %v312_v34  ;;  %v3628_v48 = vcombine.high %v556_v42, %v560_v44  ;;  %v392_v30 = vld [vmem:[%s4114_s25 + $0x4b8] sm:$0xff] }
 0x186   : > { %3028 = vmatprep.subr.bf16.mxu1 %v3428_v46  ;;  %v3500_v46 = vcombine.high %v428_v40, %v432_v41  ;;  %v516_v31 = vld [vmem:[%s4114_s25 + $0x898] sm:$0xff] }
 0x187   : > { %v520_v33 = vld [vmem:[%s4114_s25 + $0x8b8] sm:$0xff] }
 0x188   : > { %2988 = vmatpush2.bf16.msra.mxu0 %v3681_v52  ;;  %v552_v52 = vld [vmem:[%s4114_s25 + $0x9b8] sm:$0xff] }
 0x189   : > { %3029 = vmatpush2.bf16.msra.mxu1 %v3427_v54  ;;  %2989 = vmatprep.subr.bf16.mxu0 %v3674_v55  ;;  %v3499_v54 = vcombine.low %v428_v40, %v432_v41  ;;  %v3627_v55 = vcombine.low %v556_v42, %v560_v44  ;;  %v3620_v9 = vcombine.high %v548_v51, %v552_v52  ;;  %v384_v40 = vld [vmem:[%s4114_s25 + $0x478] sm:$0xff] }
 0x18a   : > { %3030 = vmatprep.subr.bf16.mxu1 %v3420_v56  ;;  %v3492_v56 = vcombine.high %v420_v49, %v424_v50  ;;  %v3619_v3 = vcombine.low %v548_v51, %v552_v52  ;;  %v508_v41 = vld [vmem:[%s4114_s25 + $0x858] sm:$0xff] }
 0x18b   : > { %v512_v42 = vld [vmem:[%s4114_s25 + $0x878] sm:$0xff] }
 0x18c   : > { %2990 = vmatpush2.bf16.msra.mxu0 %v3673_v60  ;;  %v540_v60 = vld [vmem:[%s4114_s25 + $0x958] sm:$0xff] }
 0x18d   : > { %3031 = vmatpush2.bf16.msra.mxu1 %v3419_v61  ;;  %2991 = vmatprep.subr.bf16.mxu0 %v3666_v62  ;;  %v544_v61 = vld [vmem:[%s4114_s25 + $0x978] sm:$0xff] }
 0x18e   : > { %3032 = vmatprep.subr.bf16.mxu1 %v3412_v0  ;;  %v376_v49 = vld [vmem:[%s4114_s25 + $0x438] sm:$0xff] }
 0x18f   : > { %v500_v50 = vld [vmem:[%s4114_s25 + $0x818] sm:$0xff] }
 0x190   : > { %2992 = vmatpush2.bf16.msra.mxu0 %v3665_v5  ;;  %v504_v51 = vld [vmem:[%s4114_s25 + $0x838] sm:$0xff] }
 0x191   : > { %3033 = vmatpush2.bf16.msra.mxu1 %v3411_v6  ;;  %2993 = vmatprep.subr.bf16.mxu0 %v3658_v7  ;;  %v404_v7 = vld [vmem:[%s4114_s25 + $0x518] sm:$0xff] }
 0x192   : > { %3034 = vmatprep.subr.bf16.mxu1 %v3404_v10  ;;  %v408_v10 = vld [vmem:[%s4114_s25 + $0x538] sm:$0xff] }
 0x193   : > { %v3475_v24 = vcombine.low %v404_v7, %v408_v10  ;;  %v620_v58 = vld [vmem:[%s4114_s25 + $0xbd8] sm:$0xff] }
 0x194   : > { %2994 = vmatpush2.bf16.msra.mxu0 %v3657_v16 }
 0x195   : > { %3035 = vmatpush2.bf16.msra.mxu1 %v3403_v17  ;;  %2995 = vmatprep.subr.bf16.mxu0 %v3650_v18  ;;  %v3611_v17 = vcombine.low %v540_v60, %v544_v61 }
 0x196   : > { %3036 = vmatprep.subr.bf16.mxu1 %v3396_v19  ;;  %v3604_v19 = vcombine.high %v532_v11, %v536_v12 }
 0x198   : > { %2996 = vmatpush2.bf16.msra.mxu0 %v3649_v25  ;;  %v3603_v25 = vcombine.low %v532_v11, %v536_v12 }
 0x199   : > { %3037 = vmatpush2.bf16.msra.mxu1 %v3395_v26  ;;  %2997 = vmatprep.subr.bf16.mxu0 %v3642_v27  ;;  %v3596_v27 = vcombine.high %v524_v21, %v528_v23 }
 0x19a   : > { %3038 = vmatprep.subr.bf16.mxu1 %v3388_v29  ;;  %v388_v29 = vld [vmem:[%s4114_s25 + $0x498] sm:$0xff] }
 0x19b   : > { %v3459_v44 = vcombine.low %v388_v29, %v392_v30 }
 0x19c   : > { %2998 = vmatpush2.bf16.msra.mxu0 %v3641_v35  ;;  %v3595_v35 = vcombine.low %v524_v21, %v528_v23  ;;  %v472_v21 = vld [vmem:[%s4114_s25 + $0x738] sm:$0xff] }
 0x19d   : > { %3039 = vmatpush2.bf16.msra.mxu1 %v3387_v36  ;;  %2999 = vmatprep.subr.bf16.mxu0 %v3634_v37  ;;  %v3460_v36 = vcombine.high %v388_v29, %v392_v30  ;;  %v3588_v37 = vcombine.high %v516_v31, %v520_v33  ;;  %v596_v23 = vld [vmem:[%s4114_s25 + $0xb18] sm:$0xff] }
 0x19e   : > { %3040 = vmatprep.subr.bf16.mxu1 %v3380_v39  ;;  %v380_v39 = vld [vmem:[%s4114_s25 + $0x458] sm:$0xff] }
 0x19f   : > { %v3451_v52 = vcombine.low %v380_v39, %v384_v40  ;;  %v460_v30 = vld [vmem:[%s4114_s25 + $0x6d8] sm:$0xff] }
 0x1a0   : > { %3000 = vmatpush2.bf16.msra.mxu0 %v3633_v45  ;;  %v3587_v45 = vcombine.low %v516_v31, %v520_v33  ;;  %v464_v31 = vld [vmem:[%s4114_s25 + $0x6f8] sm:$0xff] }
 0x1a1   : > { %3041 = vmatpush2.bf16.msra.mxu1 %v3379_v53  ;;  %3051 = vmatprep.subr.bf16.mxu0 %v3500_v46  ;;  %v3452_v53 = vcombine.high %v380_v39, %v384_v40  ;;  %v3580_v46 = vcombine.high %v508_v41, %v512_v42  ;;  %v588_v33 = vld [vmem:[%s4114_s25 + $0xad8] sm:$0xff] }
 0x1a2   : > { %3092 = vmatprep.subr.bf16.mxu1 %v3628_v48  ;;  %v372_v48 = vld [vmem:[%s4114_s25 + $0x418] sm:$0xff] }
 0x1a3   : > { %v2757_v59 = vpop.f32.mrf.mxu0  ;;  %3002 = vmatmul.mubr.bf16.vlgmr.msra.gmra.mxu0 %v4188_v32  ;;  %v452_v40 = vld [vmem:[%s4114_s25 + $0x698] sm:$0xff] }
 0x1a4   : > { %v4520_v62 = vadd.f32 %v2757_v59, %v4448_v28  ;;  %v4522_v0 = vpop.f32.mrf.mxu1  ;;  %3043 = vmatmul.mubr.bf16.vlgmr.msra.gmra.mxu1 %v4216_v22  ;;  %3052 = vmatpush1.bf16.msra.mxu0 %v3499_v54  ;;  %v3612_v28 = vcombine.high %v540_v60, %v544_v61  ;;  %v3579_v54 = vcombine.low %v508_v41, %v512_v42  ;;  %v624_v59 = vld [vmem:[%s4114_s25 + $0xbf8] sm:$0xff] }
 0x1a5   : > { %3093 = vmatpush1.bf16.msra.mxu1 %v3627_v55  ;;  %v2759_v2 = vpop.f32.mrf.mxu0  ;;  %3053 = vmatprep.subr.bf16.mxu0 %v3492_v56  ;;  %v3444_v55 = vcombine.high %v372_v48, %v376_v49  ;;  %v3572_v56 = vcombine.high %v500_v50, %v504_v51  ;;  %v3443_v60 = vcombine.low %v372_v48, %v376_v49  ;;  %v456_v41 = vld [vmem:[%s4114_s25 + $0x6b8] sm:$0xff] }
 0x1a6   : > { %v4526_v5 = vadd.f32 %v2759_v2, %v4456_v47  ;;  %v4528_v6 = vpop.f32.mrf.mxu1  ;;  %3094 = vmatprep.subr.bf16.mxu1 %v3620_v9  ;;  %3083 = vmatprep.mubr.bf16.mxu0 %v4172_v13  ;;  %v3476_v13 = vcombine.high %v404_v7, %v408_v10  ;;  %v492_v9 = vld [vmem:[%s4114_s25 + $0x7d8] sm:$0xff]  ;;  %v3571_v61 = vcombine.low %v500_v50, %v504_v51 }
 0x1a7   : > { %v2761_v22 = vpop.f32.mrf.mxu0  ;;  %3124 = vmatprep.mubr.bf16.mxu1 %v4231_v38  ;;  %v396_v38 = vld [vmem:[%s4114_s25 + $0x4d8] sm:$0xff]  ;;  %v3692_v2 = vcombine.high %v620_v58, %v624_v59  ;;  %v3563_v10 = vcombine.low %v492_v9, %v496_v57 }
 0x1a8   : > { %v3141_v47 = vcombine.low %v4520_v62, %v4526_v5  ;;  %v2802_v14 = vpop.f32.mrf.mxu1  ;;  %3054 = vmatpush1.bf16.msra.mxu0 %v3491_v1  ;;  %v3468_v26 = vcombine.high %v396_v38, %v400_v20  ;;  %v3467_v34 = vcombine.low %v396_v38, %v400_v20  ;;  %v3564_v1 = vcombine.high %v492_v9, %v496_v57  ;;  %v616_v7 = vld [vmem:[%s4114_s25 + $0xbb8] sm:$0xff] }
 0x1a9   : > { %3095 = vmatpush1.bf16.msra.mxu1 %v3619_v3  ;;  %v2762_v16 = vpop.f32.mrf.mxu0  ;;  %3055 = vmatprep.subr.bf16.mxu0 %v3484_v4  ;;  %v484_v3 = vld [vmem:[%s4114_s25 + $0x798] sm:$0xff]  ;;  %v3691_v22 = vcombine.low %v620_v58, %v624_v59 }
 0x1aa   : > { %v2803_v18 = vpop.f32.mrf.mxu1  ;;  %3096 = vmatprep.subr.bf16.mxu1 %v3612_v28  ;;  %v488_v4 = vld [vmem:[%s4114_s25 + $0x7b8] sm:$0xff] }
 0x1ab   : > { %v612_v28 = vld [vmem:[%s4114_s25 + $0xb98] sm:$0xff]  ;;  %v3556_v11 = vcombine.high %v484_v3, %v488_v4 }
 0x1ac   : > { %3056 = vmatpush1.bf16.msra.mxu0 %v3483_v15  ;;  %v3684_v12 = vcombine.high %v612_v28, %v616_v7  ;;  %v476_v14 = vld [vmem:[%s4114_s25 + $0x758] sm:$0xff]  ;;  %v3683_v18 = vcombine.low %v612_v28, %v616_v7  ;;  %v641_v28 = vsub.s32 3, %v4142_v43 }
 0x1ad   : > { %3097 = vmatpush1.bf16.msra.mxu1 %v3611_v17  ;;  %3057 = vmatprep.subr.bf16.mxu0 %v3476_v13  ;;  %v480_v15 = vld [vmem:[%s4114_s25 + $0x778] sm:$0xff]  ;;  %v3555_v13 = vcombine.low %v484_v3, %v488_v4  ;;  %v637_v3 = vsub.s32 2, %v4142_v43 }
 0x1ae   : > { %3098 = vmatprep.subr.bf16.mxu1 %v3604_v19  ;;  %v604_v16 = vld [vmem:[%s4114_s25 + $0xb58] sm:$0xff]  ;;  %v3548_v19 = vcombine.high %v476_v14, %v480_v15 }
 0x1af   : > { %v608_v17 = vld [vmem:[%s4114_s25 + $0xb78] sm:$0xff] }
 0x1b0   : > { %3058 = vmatpush1.bf16.msra.mxu0 %v3475_v24  ;;  %v3676_v38 = vcombine.high %v604_v16, %v608_v17  ;;  %v468_v20 = vld [vmem:[%s4114_s25 + $0x718] sm:$0xff] }
 0x1b1   : > { %3099 = vmatpush1.bf16.msra.mxu1 %v3603_v25  ;;  %3059 = vmatprep.subr.bf16.mxu0 %v3468_v26  ;;  %v600_v24 = vld [vmem:[%s4114_s25 + $0xb38] sm:$0xff]  ;;  %v3547_v25 = vcombine.low %v476_v14, %v480_v15  ;;  %v3675_v26 = vcombine.low %v604_v16, %v608_v17  ;;  %v642_v14 = vrot.slane %v4433_v8, %v641_v28 }
 0x1b2   : > { %3100 = vmatprep.subr.bf16.mxu1 %v3596_v27  ;;  %v3540_v27 = vcombine.high %v468_v20, %v472_v21  ;;  %v3668_v29 = vcombine.high %v596_v23, %v600_v24  ;;  %v580_v42 = vld [vmem:[%s4114_s25 + $0xa98] sm:$0xff] }
 0x1b3   : > { %v444_v49 = vld [vmem:[%s4114_s25 + $0x658] sm:$0xff] }
 0x1b4   : > { %3060 = vmatpush1.bf16.msra.mxu0 %v3467_v34  ;;  %v592_v34 = vld [vmem:[%s4114_s25 + $0xaf8] sm:$0xff] }
 0x1b5   : > { %3101 = vmatpush1.bf16.msra.mxu1 %v3595_v35  ;;  %3061 = vmatprep.subr.bf16.mxu0 %v3460_v36  ;;  %v3539_v35 = vcombine.low %v468_v20, %v472_v21  ;;  %v3667_v36 = vcombine.low %v596_v23, %v600_v24  ;;  %v3660_v39 = vcombine.high %v588_v33, %v592_v34  ;;  %v448_v50 = vld [vmem:[%s4114_s25 + $0x678] sm:$0xff] }
 0x1b6   : > { %3102 = vmatprep.subr.bf16.mxu1 %v3588_v37  ;;  %v3532_v37 = vcombine.high %v460_v30, %v464_v31  ;;  %v572_v51 = vld [vmem:[%s4114_s25 + $0xa58] sm:$0xff] }
 0x1b7   : > { %v436_v57 = vld [vmem:[%s4114_s25 + $0x618] sm:$0xff] }
 0x1b8   : > { %3062 = vmatpush1.bf16.msra.mxu0 %v3459_v44  ;;  %v584_v44 = vld [vmem:[%s4114_s25 + $0xab8] sm:$0xff] }
 0x1b9   : > { %3103 = vmatpush1.bf16.msra.mxu1 %v3587_v45  ;;  %3063 = vmatprep.subr.bf16.mxu0 %v3452_v53  ;;  %v3531_v45 = vcombine.low %v460_v30, %v464_v31  ;;  %v3659_v53 = vcombine.low %v588_v33, %v592_v34  ;;  %v3652_v48 = vcombine.high %v580_v42, %v584_v44  ;;  %v440_v58 = vld [vmem:[%s4114_s25 + $0x638] sm:$0xff]  ;;  %v649_v33 = vsub.s32 5, %v4142_v43 }
 0x1ba   : > { %3104 = vmatprep.subr.bf16.mxu1 %v3580_v46  ;;  %v3524_v46 = vcombine.high %v452_v40, %v456_v41  ;;  %v564_v59 = vld [vmem:[%s4114_s25 + $0xa18] sm:$0xff]  ;;  %v3507_v7 = vcombine.low %v436_v57, %v440_v58 }
 0x1bc   : > { %3064 = vmatpush1.bf16.msra.mxu0 %v3451_v52  ;;  %v576_v52 = vld [vmem:[%s4114_s25 + $0xa78] sm:$0xff] }
 0x1bd   : > { %3105 = vmatpush1.bf16.msra.mxu1 %v3579_v54  ;;  %3065 = vmatprep.subr.bf16.mxu0 %v3444_v55  ;;  %v3523_v54 = vcombine.low %v452_v40, %v456_v41  ;;  %v3651_v55 = vcombine.low %v580_v42, %v584_v44  ;;  %v3644_v9 = vcombine.high %v572_v51, %v576_v52 }
 0x1be   : > { %3106 = vmatprep.subr.bf16.mxu1 %v3572_v56  ;;  %v3516_v56 = vcombine.high %v444_v49, %v448_v50 }
 0x1c0   : > { %3066 = vmatpush1.bf16.msra.mxu0 %v3443_v60  ;;  %v568_v60 = vld [vmem:[%s4114_s25 + $0xa38] sm:$0xff] }
 0x1c1   : > { %3107 = vmatpush1.bf16.msra.mxu1 %v3571_v61  ;;  %3067 = vmatprep.subr.bf16.mxu0 %v3564_v1  ;;  %v3515_v61 = vcombine.low %v444_v49, %v448_v50  ;;  %v3643_v1 = vcombine.low %v572_v51, %v576_v52  ;;  %v3636_v4 = vcombine.high %v564_v59, %v568_v60 }
 0x1c2   : > { %3108 = vmatprep.subr.bf16.mxu1 %v3692_v2  ;;  %v3508_v2 = vcombine.high %v436_v57, %v440_v58  ;;  %v653_v58 = vsub.s32 6, %v4142_v43 }
 0x1c4   : > { %3068 = vmatpush2.bf16.msra.mxu0 %v3563_v10  ;;  %v3635_v10 = vcombine.low %v564_v59, %v568_v60  ;;  %v657_v59 = vsub.s32 7, %v4142_v43  ;;  %v654_v60 = vrot.slane %v4433_v8, %v653_v58 }
 0x1c5   : > { %3109 = vmatpush2.bf16.msra.mxu1 %v3691_v22  ;;  %3069 = vmatprep.subr.bf16.mxu0 %v3556_v11  ;;  %v638_v22 = vrot.slane %v4433_v8, %v637_v3  ;;  %v3930_v11 = vmov 1983009808  }
 0x1c6   : > { %3110 = vmatprep.subr.bf16.mxu1 %v3684_v12  ;;  %v3144_v12 = vunpack.c.l.s4 %v3930_v11 }
 0x1c7   : > { %v2799_v15 = vadd.f32 %v4522_v0, %v638_v22 }
 0x1c8   : > { %3070 = vmatpush2.bf16.msra.mxu0 %v3555_v13  ;;  %v3145_v17 = vunpack.c.0.s8 %v3144_v12  ;;  %v2801_v13 = vadd.f32 %v4528_v6, %v642_v14 }
 0x1c9   : > { %3111 = vmatpush2.bf16.msra.mxu1 %v3683_v18  ;;  %3071 = vmatprep.subr.bf16.mxu0 %v3548_v19 }
 0x1ca   : > { %3112 = vmatprep.subr.bf16.mxu1 %v3676_v38  ;;  %v3148_v24 = vsub.s32 %v3145_v17, %v4142_v43 }
 0x1cc   : > { %3072 = vmatpush2.bf16.msra.mxu0 %v3547_v25  ;;  %v3149_v6 = vrot.slane %v3141_v47, %v3148_v24 }
 0x1cd   : > { %3113 = vmatpush2.bf16.msra.mxu1 %v3675_v26  ;;  %3073 = vmatprep.subr.bf16.mxu0 %v3540_v27 }
 0x1ce   : > { %3114 = vmatprep.subr.bf16.mxu1 %v3668_v29 }
 0x1d0   : > { %3074 = vmatpush2.bf16.msra.mxu0 %v3539_v35  ;;  %v650_v35 = vrot.slane %v4433_v8, %v649_v33 }
 0x1d1   : > { %3115 = vmatpush2.bf16.msra.mxu1 %v3667_v36  ;;  %3075 = vmatprep.subr.bf16.mxu0 %v3532_v37 }
 0x1d2   : > { %3116 = vmatprep.subr.bf16.mxu1 %v3660_v39 }
 0x1d4   : > { %3076 = vmatpush2.bf16.msra.mxu0 %v3531_v45 }
 0x1d5   : > { %3117 = vmatpush2.bf16.msra.mxu1 %v3659_v53  ;;  %3077 = vmatprep.subr.bf16.mxu0 %v3524_v46 }
 0x1d6   : > { %3118 = vmatprep.subr.bf16.mxu1 %v3652_v48 }
 0x1d8   : > { %3078 = vmatpush2.bf16.msra.mxu0 %v3523_v54 }
 0x1d9   : > { %3119 = vmatpush2.bf16.msra.mxu1 %v3651_v55  ;;  %3079 = vmatprep.subr.bf16.mxu0 %v3516_v56 }
 0x1da   : > { %3120 = vmatprep.subr.bf16.mxu1 %v3644_v9 }
 0x1dc   : > { %3080 = vmatpush2.bf16.msra.mxu0 %v3515_v61  ;;  %v658_v61 = vrot.slane %v4433_v8, %v657_v59 }
 0x1dd   : > { %3121 = vmatpush2.bf16.msra.mxu1 %v3643_v1  ;;  %3081 = vmatprep.subr.bf16.mxu0 %v3508_v2 }
 0x1de   : > { %3122 = vmatprep.subr.bf16.mxu1 %v3636_v4 }
 0x1e0   : > { %3082 = vmatpush2.bf16.msra.mxu0 %v3507_v7 }
 0x1e1   : > { %3123 = vmatpush2.bf16.msra.mxu1 %v3635_v10 }
 0x1e3   : > { %v2839_v16 = vpop.f32.mrf.mxu0  ;;  %3084 = vmatmul.mubr.bf16.vlgmr.msra.gmra.mxu0 %v4226_v63 }
 0x1e4   : > { %v2840_v18 = vadd.f32 %v2839_v16, %v2799_v15  ;;  %v2880_v19 = vpop.f32.mrf.mxu1  ;;  %3125 = vmatmul.mubr.bf16.vlgmr.msra.gmra.mxu1 %v4188_v32  ;;  %v645_v32 = vsub.s32 4, %v4142_v43 }
 0x1e5   : > { %v2841_v38 = vpop.f32.mrf.mxu0 }
 0x1e6   : > { %v2842_v20 = vadd.f32 %v2841_v38, %v2801_v13  ;;  %v2882_v21 = vpop.f32.mrf.mxu1  ;;  %v2881_v25 = vadd.f32 %v2880_v19, %v2840_v18  ;;  %v646_v34 = vrot.slane %v4433_v8, %v645_v32 }
 0x1e7   : > { %v2843_v23 = vpop.f32.mrf.mxu0 }
 0x1e8   : > { %v2883_v26 = vadd.f32 %v2882_v21, %v2842_v20  ;;  %v2884_v0 = vpop.f32.mrf.mxu1 }
 0x1e9   : > { %v2844_v27 = vpop.f32.mrf.mxu0 }
 0x1ea   : > { %v3142_v29 = vcombine.low %v2881_v25, %v2883_v26  ;;  %v2885_v63 = vpop.f32.mrf.mxu1 }
 0x1ec   : > { %v3156_v30 = vrot.slane %v3142_v29, %v3148_v24 }
 0x1ee   : > { %v3157_v31 = vcombine.low %v3149_v6, %v3156_v30 }
 0x1f0   : > { %3177 = vst [vmem:[%s4599_s10] sm:$0xff] %v3157_v31 }
 0x223   : > { %v2921_v36 = vpop.f32.mrf.mxu0 }
 0x224   : > { %v2922_v37 = vadd.f32 %v2921_v36, %v646_v34  ;;  %v2962_v39 = vpop.f32.mrf.mxu1 }
 0x225   : > { %v2923_v40 = vpop.f32.mrf.mxu0 }
 0x226   : > { %v2963_v62 = vadd.f32 %v2962_v39, %v2922_v37  ;;  %v2924_v5 = vadd.f32 %v2923_v40, %v650_v35  ;;  %v2964_v47 = vpop.f32.mrf.mxu1 }
 0x227   : > { %v2925_v41 = vpop.f32.mrf.mxu0 }
 0x228   : > { %v2965_v42 = vadd.f32 %v2964_v47, %v2924_v5  ;;  %v2966_v44 = vpop.f32.mrf.mxu1 }
 0x229   : > { %v2926_v45 = vpop.f32.mrf.mxu0 }
 0x22a   : > { %v2967_v53 = vpop.f32.mrf.mxu1 }
 0x263   : > { %v3003_v46 = vpop.f32.mrf.mxu0 }
 0x264   : > { %v3004_v48 = vadd.f32 %v3003_v46, %v2963_v62  ;;  %v3044_v49 = vpop.f32.mrf.mxu1 }
 0x265   : > { %v3005_v50 = vpop.f32.mrf.mxu0  ;;  %v3045_v1 = vadd.f32 %v3044_v49, %v654_v60 }
 0x266   : > { %v3006_v51 = vadd.f32 %v3005_v50, %v2965_v42  ;;  %v3046_v52 = vpop.f32.mrf.mxu1 }
 0x267   : > { %v3007_v54 = vpop.f32.mrf.mxu0  ;;  %v3047_v3 = vadd.f32 %v3046_v52, %v658_v61 }
 0x268   : > { %v3158_v55 = vcombine.low %v3004_v48, %v3006_v51  ;;  %v3048_v56 = vpop.f32.mrf.mxu1 }
 0x269   : > { %v3008_v9 = vpop.f32.mrf.mxu0 }
 0x26a   : > { %v3049_v57 = vpop.f32.mrf.mxu1  ;;  %v3166_v17 = vrot.slane %v3158_v55, %v3148_v24 }
 0x2a3   : > { %v3085_v2 = vpop.f32.mrf.mxu0 }
 0x2a4   : > { %v3086_v4 = vadd.f32 %v3085_v2, %v3045_v1  ;;  %v3126_v28 = vpop.f32.mrf.mxu1 }
 0x2a5   : > { %v3087_v7 = vpop.f32.mrf.mxu0 }
 0x2a6   : > { %v3088_v10 = vadd.f32 %v3087_v7, %v3047_v3  ;;  %v3128_v22 = vpop.f32.mrf.mxu1  ;;  %v3127_v12 = vadd.f32 %v3126_v28, %v3086_v4 }
 0x2a7   : > { %v3089_v11 = vpop.f32.mrf.mxu0 }
 0x2a8   : > { %v3129_v14 = vadd.f32 %v3128_v22, %v3088_v10  ;;  %v3130_v43 = vpop.f32.mrf.mxu1 }
 0x2a9   : > { %v3090_v15 = vpop.f32.mrf.mxu0 }
 0x2aa   : > { %v3159_v16 = vcombine.low %v3127_v12, %v3129_v14  ;;  %v3131_v8 = vpop.f32.mrf.mxu1 }
 0x2ac   : > { %v3173_v13 = vrot.slane %v3159_v16, %v3148_v24 }
 0x2ae   : > { %v3174_v18 = vcombine.low %v3166_v17, %v3173_v13 }
 0x2b0   : > { %3178 = vst [vmem:[%s4599_s10 + $0x8] sm:$0xff] %v3174_v18 }
 0x2b1   : > { %3866 = shalt.err (!%p3863_p1)
}
 0x2b2   : > { %s3867_s21 = scalar_lea.hbm %s3192_s9, 256  ;;  %s3871_s23 = scalar_lea.hbm %s4650_s3, 512 }
 0x2b3   : > { %p3868_p7 = scmp.ne.s32.totalorder %s3192_s9, %s3867_s21  ;;  %p3872_p3 = scmp.lt.s32.totalorder %s3192_s9, %s4650_s3 }
 0x2b4   : > { %p3873_p4 = scmp.lt.s32.totalorder %s3871_s23, %s3867_s21 }
 0x2b5   : > { %p3869_p11 = pnand %p3868_p7, %p4664_p5 }
 0x2b6   : > { %p3874_p6 = por %p3873_p4, %p3872_p3 }
 0x2b7   : > { %p3870_p8 = pneg %p3869_p11 }
 0x2b9   : > { %p3875_p9 = pnand %p3874_p6, %p3870_p8 }
 0x2bb   : > { %3878 = shalt.err (!%p3875_p9)
}
 0x2bc   : > { %3711 = dma.vmem_to_hbm [thread:$0]  (%p4664_p5), %s3195_s5, 256, %s3192_s9, %s3180_s6  }
 0x2bd PF: > { %s3206_s28 = sand.u32 1, %s3909_s12   ;;  %p4665_p12 = scmp.ne.s32.totalorder %s4658_s29, 0 }
 0x2be   : > { %p4666_p0 = scmp.ge.s32.totalorder %s3921_s15, 2  ;;  %s3207_s4 = scalar_lea.sflag [#allocation4], %s3206_s28 }
 0x2c0   : > { %p3725_p10 = pnand %p4666_p0, %p4665_p12 }
 0x2c2   : > { %p3726_p2 = pneg %p3725_p10 }
 0x2c4   : > { %3904 = dma.done.wait (%p3726_p2), %s3207_s4, 256  }
 0x2c5   : > { %3906 = vsyncadd (%p3726_p2), %s3207_s4, 4294967040  ;;  %p17_p13 = scmp.ge.s32.totalorder %s3973_s16, 4   ;;  %s4667_s12 = smov %s3913_s13 }
 0x2c6   : > { %s4668_s13 = smov %s3917_s14  ;;  %s4669_s14 = smov %s3984_s19 }
 0x2c7   : > { %s4670_s15 = smov %s3973_s16  ;;  %19 = sbr.rel (!%p17_p13) target bundleno = 6 (0x6), region = 93 }
 0x2cc   :  { %3212 = vsyncpa [#allocation3], 1 }
 0x2cd   :  { %3214 = vsyncpa [#allocation3 + $0x1], 1 }
 0x2ce   :  { %3215 = vsyncpa [#allocation6], 1 }
 0x2cf   :  { %3217 = vsyncpa [#allocation6 + $0x1], 1 }
 0x2d0   :  { %3218 = vsyncpa [#allocation4], 1 }
 0x2d1   :  { %3220 = vsyncpa [#allocation4 + $0x1], 1 }

</bundles_post_ra>
